<compile_context>
chip_gen: v7x
topology: tpu7x:2x2x1
jax: 0.10.0
libtpu: 0.0.40
codegen_flags: <defaults>
</compile_context>

<pallas_src>
import jax
import jax.numpy as jnp
from jax.experimental import pallas as pl
from jax.experimental.pallas import tpu as pltpu

IN_FEATURES = 56 * 56      # 3136 (fixed by the module definition)
OUT_FEATURES = 256


def linear_relu_kernel(x_ref, w_ref, o_ref):
    # x_ref: (tm, 3136) f32, w_ref: (3136, 256) bf16, o_ref: (tm, 256) f32.
    # Cast x on the VPU inside the kernel (hidden under the DMA); accumulate
    # the MXU matmul in f32.
    acc = jnp.dot(
        x_ref[...].astype(jnp.bfloat16),
        w_ref[...],
        preferred_element_type=jnp.float32,
    )
    o_ref[...] = jnp.maximum(acc, 0.0).astype(o_ref.dtype)


def _round_up(v, m):
    return ((v + m - 1) // m) * m


def prepare_weight(w):
    """One-time model-setup step: PyTorch-layout (256, 3136) f32 weight ->
    resident, pre-transposed bf16 (3136, 256) param for the kernel."""
    assert w.shape == (OUT_FEATURES, IN_FEATURES)
    return w.T.astype(jnp.bfloat16)


def linear_relu(x, w_t_bf16, *, tm=None):
    """x: (B, 3136) f32, w_t_bf16: (3136, 256) bf16 pre-transposed weight."""
    B, K = x.shape
    Kw, N = w_t_bf16.shape
    assert K == Kw == IN_FEATURES and N == OUT_FEATURES

    if tm is None:
        # Up to 256 MXU rows per step (amortizes grid-step overhead, matches
        # the 256x256 MXU, fits v5e's default scoped VMEM); stay 8-aligned
        # for tiny batches so we do not DMA padded rows.
        tm = min(256, _round_up(B, 8))
    bp = _round_up(B, tm)

    # Only the ragged batch tail is padded (no K / N padding, no dtype copies).
    if bp != B:
        x = jnp.pad(x, ((0, bp - B), (0, 0)))

    ni = bp // tm  # batch tiles

    cost = pl.CostEstimate(
        flops=2 * bp * K * N,
        transcendentals=0,
        bytes_accessed=bp * K * 4 + K * N * 2 + bp * N * 4,
    )

    out = pl.pallas_call(
        linear_relu_kernel,
        out_shape=jax.ShapeDtypeStruct((bp, N), jnp.float32),
        grid_spec=pltpu.PrefetchScalarGridSpec(
            num_scalar_prefetch=0,
            # Single grid axis over the batch: the (3136, 256) bf16 weight
            # block is index-invariant (fetched once, VMEM-resident), x is
            # streamed exactly once, and the 256-wide output store is
            # lane-dense.  The batch axis is "parallel" so v7x megacore can
            # split large batches across its two TensorCores.
            grid=(ni,),
            in_specs=[
                pl.BlockSpec((tm, K), lambda i: (i, 0)),
                pl.BlockSpec((K, N), lambda i: (0, 0)),
            ],
            out_specs=pl.BlockSpec((tm, N), lambda i: (i, 0)),
        ),
        compiler_params=pltpu.CompilerParams(
            dimension_semantics=("parallel",),
        ),
        cost_estimate=cost,
    )(x, w_t_bf16)

    return out[:B]


if __name__ == "__main__":
    key = jax.random.PRNGKey(0)
    kx, kw = jax.random.split(key)

    B = 8  # small batch; in_features is fixed to 56*56 by the module
    x = jax.random.normal(kx, (B, IN_FEATURES), dtype=jnp.float32)

    # Deterministic init of fc.weight with PyTorch shape (out, in) = (256, 3136).
    bound = 1.0 / (IN_FEATURES ** 0.5)
    w = jax.random.uniform(
        kw, (OUT_FEATURES, IN_FEATURES), dtype=jnp.float32,
        minval=-bound, maxval=bound)

    # One-time param prep (transpose + bf16 cast), outside the per-call path.
    w_t_bf16 = prepare_weight(w)

    out = linear_relu(x, w_t_bf16)
    out = jax.block_until_ready(out)
    assert out.shape == (B, OUT_FEATURES)
    assert out.dtype == jnp.float32

    # Reference with the same bf16 operand rounding (f32 accumulation),
    # matching the kernel's MXU math.
    xr = x.astype(jnp.bfloat16).astype(jnp.float32)
    wr = w_t_bf16.astype(jnp.float32)
    ref = jnp.maximum(xr @ wr, 0.0)
    assert jnp.allclose(out, ref, atol=1e-3, rtol=1e-3)

    # Loose check against the pure-f32 PyTorch-equivalent forward (the bf16
    # operand rounding is the only deviation from the f32 forward).
    ref_f32 = jnp.maximum(x @ w.T, 0.0)
    assert jnp.allclose(out, ref_f32, atol=5e-2, rtol=5e-2)

    print("KERNEL_OK")
</pallas_src>

<mosaic_0001>
module attributes {stable_mosaic.version = 11 : i64} {
  func.func @linear_relu_kernel(%arg0: i32, %arg1: memref<8x3136xf32, #tpu.memory_space<vmem>>, %arg2: memref<3136x256xbf16, #tpu.memory_space<vmem>>, %arg3: memref<8x256xf32, #tpu.memory_space<vmem>>) attributes {dimension_semantics = [#tpu.dimension_semantics<parallel>], iteration_bounds = array<i64: 1>, scalar_prefetch = 0 : i64, scratch_operands = 0 : i64, tpu.core_type = #tpu.core_type<tc>, window_params = [{transform_indices = @transform_0, window_bounds = array<i64: 8, 3136>}, {pipeline_mode = #tpu.pipeline_mode<synchronous>, transform_indices = @transform_1, window_bounds = array<i64: 3136, 256>}, {transform_indices = @transform_2, window_bounds = array<i64: 8, 256>}]} {
    %c0 = arith.constant 0 : index
    %c0_0 = arith.constant 0 : index
    %0 = vector.load %arg1[%c0, %c0_0] : memref<8x3136xf32, #tpu.memory_space<vmem>>, vector<8x3136xf32>
    %1 = arith.truncf %0 : vector<8x3136xf32> to vector<8x3136xbf16>
    %c0_1 = arith.constant 0 : index
    %c0_2 = arith.constant 0 : index
    %2 = vector.load %arg2[%c0_1, %c0_2] : memref<3136x256xbf16, #tpu.memory_space<vmem>>, vector<3136x256xbf16>
    %cst = arith.constant dense<0.000000e+00> : vector<8x256xf32>
    %3 = tpu.matmul %1, %2, %cst {dimension_numbers = #tpu.dot_dimension_numbers<[1], [0], [0], [1], [0, 0, 1, 1], [], []>} : vector<8x3136xbf16>, vector<3136x256xbf16>, vector<8x256xf32> -> vector<8x256xf32>
    %cst_3 = arith.constant 0.000000e+00 : f32
    %4 = vector.broadcast %cst_3 : f32 to vector<8x256xf32>
    %5 = arith.maximumf %3, %4 : vector<8x256xf32>
    %c0_4 = arith.constant 0 : index
    %c0_5 = arith.constant 0 : index
    %6 = vector.load %arg3[%c0_4, %c0_5] : memref<8x256xf32, #tpu.memory_space<vmem>>, vector<8x256xf32>
    tpu.vector_store %arg3[%c0_4, %c0_5], %5 {strides = array<i32>} : memref<8x256xf32, #tpu.memory_space<vmem>>, vector<8x256xf32>,
    return
  }
  func.func @transform_0(%arg0: i32) -> (i32, i32) {
    %c0_i32 = arith.constant 0 : i32
    %c0_i32_0 = arith.constant 0 : i32
    return %arg0, %c0_i32 : i32, i32
  }
  func.func @transform_1(%arg0: i32) -> (i32, i32) {
    %c0_i32 = arith.constant 0 : i32
    %c0_i32_0 = arith.constant 0 : i32
    %c0_i32_1 = arith.constant 0 : i32
    return %c0_i32, %c0_i32_0 : i32, i32
  }
  func.func @transform_2(%arg0: i32) -> (i32, i32) {
    %c0_i32 = arith.constant 0 : i32
    %c0_i32_0 = arith.constant 0 : i32
    return %arg0, %c0_i32 : i32, i32
  }
}

</mosaic_0001>

<bundles_post_ra>
// kernel: tpu_custom_call.1
= control target key start
LH: loop header
LB: loop body
LE: loop exit
PB: predicated region body
PF: predicated region fallthrough
CT: control target
= control target key end

     0   :  { %7 = vsyncpa [#allocation3], 0  ;;  %s4167_s0 = inlined_call_operand.hbm [shape: f32[8,3136], index: 0, kind: input, shape index: {}]   ;;  %s4168_s1 = inlined_call_operand.hbm [shape: bf16[3136,256], index: 1, kind: input, shape index: {}]   ;;  %s4169_s2 = inlined_call_operand.hbm [shape: f32[8,256], index: 2, kind: output, shape index: {}]  }
   0x1   :  { %8 = vsyncpa [#allocation6], 0 }
   0x2   :  { %9 = vsyncpa [#allocation4], 0  ;;  %s4103_s9 = smov [#allocation2]   ;;  %s4104_s11 = smov [#allocation5]  }
   0x3   :  { %s16_s10 = sshll.u32 %s4103_s9, 4  ;;  %s25_s12 = sshll.u32 %s4104_s11, 4  ;;  %s17_s10 = int_to_ptr.vmem [resolvable:$true] %s16_s10  ;;  %s4124_s12 = int_to_ptr.vmem [resolvable:$true] %s25_s12 }
   0x4   :  { %s4031_s15 = scalar_lea.hbm %s4167_s0, 3200 }
   0x5   :  { %p4032_p0 = scmp.ne.s32.totalorder %s4167_s0, %s4031_s15  ;;  %p4035_p1 = scmp.lt.u32.totalorder %s4031_s15, %s4167_s0 }
   0x7   :  { %p4037_p2 = pnand %p4035_p1, %p4032_p0 }
   0x9   :  { %4040 = shalt.err (!%p4037_p2)
}
   0xa   :  { %s4041_s20 = scalar_lea.vmem %s17_s10, 3200  ;;  %p4046_p4 = scmp.lt.s32.totalorder %s17_s10, %s17_s10 }
   0xb   :  { %p4042_p3 = scmp.ne.s32.totalorder %s17_s10, %s4041_s20  ;;  %p4047_p5 = scmp.lt.s32.totalorder %s4041_s20, %s4041_s20 }
   0xd   :  { %p4048_p6 = por %p4047_p5, %p4046_p4 }
   0xf   :  { %p4049_p7 = pnand %p4048_p6, %p4042_p3 }
  0x11   :  { %4052 = shalt.err (!%p4049_p7)
}
  0x12   :  { %19 = dma.hbm_to_vmem [thread:$0]  %s4167_s0, 3200, %s17_s10, [#allocation3]  }
  0x13   :  { %s4053_s25 = scalar_lea.hbm %s4168_s1, 50176 }
  0x14   :  { %p4054_p8 = scmp.ne.s32.totalorder %s4168_s1, %s4053_s25  ;;  %p4057_p9 = scmp.lt.u32.totalorder %s4053_s25, %s4168_s1 }
  0x16   :  { %p4059_p10 = pnand %p4057_p9, %p4054_p8 }
  0x18   :  { %4062 = shalt.err (!%p4059_p10)
}
  0x19   :  { %s4063_s30 = scalar_lea.vmem %s4124_s12, 50176  ;;  %p4068_p12 = scmp.lt.s32.totalorder %s4124_s12, %s4124_s12 }
  0x1a   :  { %p4064_p11 = scmp.ne.s32.totalorder %s4124_s12, %s4063_s30  ;;  %p4069_p13 = scmp.lt.s32.totalorder %s4063_s30, %s4063_s30 }
  0x1c   :  { %p4070_p0 = por %p4069_p13, %p4068_p12 }
  0x1e   :  { %p4071_p1 = pnand %p4070_p0, %p4064_p11 }
  0x20   :  { %4074 = shalt.err (!%p4071_p1)
}
  0x21   :  { %s4105_s0 = smov 128   ;;  %s4106_s3 = smov 8  }
  0x22   :  { %31 = dma.hbm_to_vmem [thread:$0]  %s4168_s1, 50176, %s4124_s12, [#allocation6], %s4105_s0, %s4105_s0, %s4106_s3  }
  0x23   :  { %4097 = dma.done.wait [#allocation3], 3200  }
  0x24   :  { %4098 = vsyncadd [#allocation3], 4294964096 }
  0x25   :  { %4099 = dma.done.wait [#allocation6], 50176  }
  0x26   :  { %4100 = vsyncadd [#allocation6], 4294917120  ;;  %v3443_v0 = vld [vmem:[#allocation5 + $0x4] ss:$8 sps:$4 sm:$0xff]   ;;  %v3447_v2 = vld [vmem:[#allocation5] ss:$8 sps:$4 sm:$0xff]  }
  0x27   :  { %v3445_v1 = vld [vmem:[#allocation5 + $0x604] ss:$8 sps:$4 sm:$0xff]   ;;  %2445 = vmatprep.subr.bf16.mxu1 %v3443_v0  ;;  %v3448_v3 = vld [vmem:[#allocation5 + $0x600] ss:$8 sps:$4 sm:$0xff]   ;;  %v3449_v4 = vld [vmem:[#allocation5 + $0x14] ss:$8 sps:$4 sm:$0xff]  }
  0x28   :  { %2691 = vmatprep.subr.bf16.mxu0 %v3445_v1  ;;  %2446 = vmatpush1.bf16.msra.mxu1 %v3447_v2  ;;  %v3451_v5 = vld [vmem:[#allocation5 + $0x614] ss:$8 sps:$4 sm:$0xff]   ;;  %v3453_v6 = vld [vmem:[#allocation5 + $0x10] ss:$8 sps:$4 sm:$0xff]   ;;  %v3455_v8 = vld [vmem:[#allocation5 + $0x24] ss:$8 sps:$4 sm:$0xff]  }
  0x29   :  { %2692 = vmatpush1.bf16.msra.mxu0 %v3448_v3  ;;  %2447 = vmatprep.subr.bf16.mxu1 %v3449_v4  ;;  %v3454_v7 = vld [vmem:[#allocation5 + $0x610] ss:$8 sps:$4 sm:$0xff]   ;;  %v3457_v9 = vld [vmem:[#allocation5 + $0x624] ss:$8 sps:$4 sm:$0xff]   ;;  %v3459_v10 = vld [vmem:[#allocation5 + $0x20] ss:$8 sps:$4 sm:$0xff]  }
  0x2a   :  { %2693 = vmatprep.subr.bf16.mxu0 %v3451_v5  ;;  %v3460_v11 = vld [vmem:[#allocation5 + $0x620] ss:$8 sps:$4 sm:$0xff]   ;;  %v3461_v12 = vld [vmem:[#allocation5 + $0x34] ss:$8 sps:$4 sm:$0xff]   ;;  %v3465_v14 = vld [vmem:[#allocation5 + $0x30] ss:$8 sps:$4 sm:$0xff]  }
  0x2b   :  { %v3463_v13 = vld [vmem:[#allocation5 + $0x634] ss:$8 sps:$4 sm:$0xff]   ;;  %v3466_v15 = vld [vmem:[#allocation5 + $0x630] ss:$8 sps:$4 sm:$0xff]   ;;  %v3467_v16 = vld [vmem:[#allocation5 + $0x44] ss:$8 sps:$4 sm:$0xff]  }
  0x2c   :  { %2448 = vmatpush1.bf16.msra.mxu1 %v3453_v6  ;;  %v3469_v17 = vld [vmem:[#allocation5 + $0x644] ss:$8 sps:$4 sm:$0xff]   ;;  %v3471_v18 = vld [vmem:[#allocation5 + $0x40] ss:$8 sps:$4 sm:$0xff]   ;;  %v3473_v20 = vld [vmem:[#allocation5 + $0x54] ss:$8 sps:$4 sm:$0xff]  }
  0x2d   :  { %2694 = vmatpush1.bf16.msra.mxu0 %v3454_v7  ;;  %2449 = vmatprep.subr.bf16.mxu1 %v3455_v8  ;;  %v3472_v19 = vld [vmem:[#allocation5 + $0x640] ss:$8 sps:$4 sm:$0xff]   ;;  %v3475_v21 = vld [vmem:[#allocation5 + $0x654] ss:$8 sps:$4 sm:$0xff]   ;;  %v3477_v22 = vld [vmem:[#allocation5 + $0x50] ss:$8 sps:$4 sm:$0xff]  }
  0x2e   :  { %2695 = vmatprep.subr.bf16.mxu0 %v3457_v9  ;;  %v3478_v23 = vld [vmem:[#allocation5 + $0x650] ss:$8 sps:$4 sm:$0xff]   ;;  %v3479_v24 = vld [vmem:[#allocation5 + $0x64] ss:$8 sps:$4 sm:$0xff]   ;;  %v3483_v26 = vld [vmem:[#allocation5 + $0x60] ss:$8 sps:$4 sm:$0xff]  }
  0x2f   :  { %v3481_v25 = vld [vmem:[#allocation5 + $0x664] ss:$8 sps:$4 sm:$0xff]   ;;  %v3484_v27 = vld [vmem:[#allocation5 + $0x660] ss:$8 sps:$4 sm:$0xff]   ;;  %v3485_v28 = vld [vmem:[#allocation5 + $0x74] ss:$8 sps:$4 sm:$0xff]  }
  0x30   :  { %2450 = vmatpush1.bf16.msra.mxu1 %v3459_v10  ;;  %v3487_v29 = vld [vmem:[#allocation5 + $0x674] ss:$8 sps:$4 sm:$0xff]   ;;  %v3489_v30 = vld [vmem:[#allocation5 + $0x70] ss:$8 sps:$4 sm:$0xff]   ;;  %v3491_v32 = vld [vmem:[#allocation5 + $0x84] ss:$8 sps:$4 sm:$0xff]  }
  0x31   :  { %2696 = vmatpush1.bf16.msra.mxu0 %v3460_v11  ;;  %2451 = vmatprep.subr.bf16.mxu1 %v3461_v12  ;;  %v3490_v31 = vld [vmem:[#allocation5 + $0x670] ss:$8 sps:$4 sm:$0xff]   ;;  %v3493_v33 = vld [vmem:[#allocation5 + $0x684] ss:$8 sps:$4 sm:$0xff]   ;;  %v3495_v34 = vld [vmem:[#allocation5 + $0x80] ss:$8 sps:$4 sm:$0xff]  }
  0x32   :  { %2697 = vmatprep.subr.bf16.mxu0 %v3463_v13  ;;  %v3496_v35 = vld [vmem:[#allocation5 + $0x680] ss:$8 sps:$4 sm:$0xff]   ;;  %v3497_v36 = vld [vmem:[#allocation5 + $0x94] ss:$8 sps:$4 sm:$0xff]   ;;  %v3501_v38 = vld [vmem:[#allocation5 + $0x90] ss:$8 sps:$4 sm:$0xff]  }
  0x33   :  { %v3499_v37 = vld [vmem:[#allocation5 + $0x694] ss:$8 sps:$4 sm:$0xff]   ;;  %v3502_v39 = vld [vmem:[#allocation5 + $0x690] ss:$8 sps:$4 sm:$0xff]   ;;  %v3503_v40 = vld [vmem:[#allocation5 + $0xa4] ss:$8 sps:$4 sm:$0xff]  }
  0x34   :  { %2452 = vmatpush1.bf16.msra.mxu1 %v3465_v14  ;;  %v3505_v41 = vld [vmem:[#allocation5 + $0x6a4] ss:$8 sps:$4 sm:$0xff]   ;;  %v3507_v42 = vld [vmem:[#allocation5 + $0xa0] ss:$8 sps:$4 sm:$0xff]   ;;  %v3509_v44 = vld [vmem:[#allocation5 + $0xb4] ss:$8 sps:$4 sm:$0xff]  }
  0x35   :  { %2698 = vmatpush1.bf16.msra.mxu0 %v3466_v15  ;;  %2453 = vmatprep.subr.bf16.mxu1 %v3467_v16  ;;  %v3508_v43 = vld [vmem:[#allocation5 + $0x6a0] ss:$8 sps:$4 sm:$0xff]   ;;  %v3511_v45 = vld [vmem:[#allocation5 + $0x6b4] ss:$8 sps:$4 sm:$0xff]   ;;  %v3513_v47 = vld [vmem:[#allocation5 + $0xb0] ss:$8 sps:$4 sm:$0xff]  }
  0x36   :  { %2699 = vmatprep.subr.bf16.mxu0 %v3469_v17  ;;  %v40_v46 = vld [vmem:[#allocation2 + $0x8] sm:$0xff]  ;;  %v3514_v49 = vld [vmem:[#allocation5 + $0x6b0] ss:$8 sps:$4 sm:$0xff]   ;;  %v3521_v56 = vld [vmem:[#allocation5 + $0xd4] ss:$8 sps:$4 sm:$0xff]   ;;  %vm2441_vm0 = vcmask 523264  }
  0x37   :  { %v65_v48 = vpack.c.bf16 %v40_v46, %v40_v46  ;;  %v52_v50 = vld [vmem:[#allocation2 + $0x68] sm:$0xff]  ;;  %v3523_v57 = vld [vmem:[#allocation5 + $0x6d4] ss:$8 sps:$4 sm:$0xff]   ;;  %v3525_v58 = vld [vmem:[#allocation5 + $0xd0] ss:$8 sps:$4 sm:$0xff]   ;;  %s4108_s1 = smov [#allocation7]  }
  0x38   :  { %2454 = vmatpush1.bf16.msra.mxu1 %v3471_v18  ;;  %v3515_v51 = vld [vmem:[#allocation5 + $0xc4] ss:$8 sps:$4 sm:$0xff]   ;;  %v77_v53 = vpack.c.bf16 %v52_v50, %v52_v50  ;;  %v3519_v54 = vld [vmem:[#allocation5 + $0xc0] ss:$8 sps:$4 sm:$0xff]   ;;  %v3526_v59 = vld [vmem:[#allocation5 + $0x6d0] ss:$8 sps:$4 sm:$0xff]  }
  0x39   :  { %2700 = vmatpush1.bf16.msra.mxu0 %v3472_v19  ;;  %2455 = vmatprep.subr.bf16.mxu1 %v3473_v20  ;;  %v3517_v52 = vld [vmem:[#allocation5 + $0x6c4] ss:$8 sps:$4 sm:$0xff]   ;;  %v3520_v55 = vld [vmem:[#allocation5 + $0x6c0] ss:$8 sps:$4 sm:$0xff]   ;;  %v3533_v0 = vld [vmem:[#allocation5 + $0xf4] ss:$8 sps:$4 sm:$0xff]  }
  0x3a   :  { %2701 = vmatprep.subr.bf16.mxu0 %v3475_v21  ;;  %2477 = vmatprep.mubr.bf16.mxu1 %v65_v48  ;;  %v3527_v60 = vld [vmem:[#allocation5 + $0xe4] ss:$8 sps:$4 sm:$0xff]   ;;  %v3531_v62 = vld [vmem:[#allocation5 + $0xe0] ss:$8 sps:$4 sm:$0xff]   ;;  %v3535_v1 = vld [vmem:[#allocation5 + $0x6f4] ss:$8 sps:$4 sm:$0xff]  }
  0x3b   :  { %2723 = vmatprep.mubr.bf16.mxu0 %v77_v53  ;;  %v3529_v61 = vld [vmem:[#allocation5 + $0x6e4] ss:$8 sps:$4 sm:$0xff]   ;;  %v3532_v63 = vld [vmem:[#allocation5 + $0x6e0] ss:$8 sps:$4 sm:$0xff]   ;;  %v3537_v2 = vld [vmem:[#allocation5 + $0xf0] ss:$8 sps:$4 sm:$0xff]  }
  0x3c   :  { %2456 = vmatpush1.bf16.msra.mxu1 %v3477_v22  ;;  %v3538_v3 = vld [vmem:[#allocation5 + $0x6f0] ss:$8 sps:$4 sm:$0xff]   ;;  %v3541_v4 = vld [vmem:[#allocation5 + $0x104] ss:$8 sps:$4 sm:$0xff]   ;;  %v3539_v8 = vld [vmem:[#allocation5 + $0x100] ss:$8 sps:$4 sm:$0xff]  }
  0x3d   :  { %2702 = vmatpush1.bf16.msra.mxu0 %v3478_v23  ;;  %2457 = vmatprep.subr.bf16.mxu1 %v3479_v24  ;;  %v39_v5 = vld [vmem:[#allocation2] sm:$0xff]  ;;  %v3544_v7 = vld [vmem:[#allocation5 + $0x704] ss:$8 sps:$4 sm:$0xff]   ;;  %v3542_v9 = vld [vmem:[#allocation5 + $0x700] ss:$8 sps:$4 sm:$0xff]   ;;  %s2988_s6 = sshll.u32 %s4108_s1, 4  ;;  %s2989_s6 = int_to_ptr.vmem [resolvable:$true] %s2988_s6 }
  0x3e   :  { %2703 = vmatprep.subr.bf16.mxu0 %v3481_v25  ;;  %v51_v6 = vld [vmem:[#allocation2 + $0x60] sm:$0xff]  ;;  %v64_v10 = vpack.c.bf16 %v39_v5, %v39_v5  ;;  %v3553_v16 = vld [vmem:[#allocation5 + $0x124] ss:$8 sps:$4 sm:$0xff]   ;;  %v3551_v18 = vld [vmem:[#allocation5 + $0x120] ss:$8 sps:$4 sm:$0xff]   ;;  %s4075_s7 = scalar_lea.vmem %s2989_s6, 256  ;;  %p4080_p3 = scmp.lt.s32.totalorder %s2989_s6, %s2989_s6 }
  0x3f   :  { %v76_v11 = vpack.c.bf16 %v51_v6, %v51_v6  ;;  %v3547_v12 = vld [vmem:[#allocation5 + $0x114] ss:$8 sps:$4 sm:$0xff]   ;;  %v3545_v14 = vld [vmem:[#allocation5 + $0x110] ss:$8 sps:$4 sm:$0xff]   ;;  %v3556_v17 = vld [vmem:[#allocation5 + $0x724] ss:$8 sps:$4 sm:$0xff]   ;;  %p4076_p2 = scmp.ne.s32.totalorder %s2989_s6, %s4075_s7  ;;  %p4081_p4 = scmp.lt.s32.totalorder %s4075_s7, %s4075_s7 }
  0x40   :  { %2458 = vmatpush1.bf16.msra.mxu1 %v3483_v26  ;;  %v3550_v13 = vld [vmem:[#allocation5 + $0x714] ss:$8 sps:$4 sm:$0xff]   ;;  %v3548_v15 = vld [vmem:[#allocation5 + $0x710] ss:$8 sps:$4 sm:$0xff]   ;;  %v3554_v19 = vld [vmem:[#allocation5 + $0x720] ss:$8 sps:$4 sm:$0xff]  }
  0x41   :  { %2704 = vmatpush1.bf16.msra.mxu0 %v3484_v27  ;;  %2459 = vmatprep.subr.bf16.mxu1 %v3485_v28  ;;  %v3559_v20 = vld [vmem:[#allocation5 + $0x134] ss:$8 sps:$4 sm:$0xff]   ;;  %v3557_v22 = vld [vmem:[#allocation5 + $0x130] ss:$8 sps:$4 sm:$0xff]   ;;  %v3565_v24 = vld [vmem:[#allocation5 + $0x144] ss:$8 sps:$4 sm:$0xff]   ;;  %p4082_p5 = por %p4081_p4, %p4080_p3 }
  0x42   :  { %2705 = vmatprep.subr.bf16.mxu0 %v3487_v29  ;;  %v3562_v21 = vld [vmem:[#allocation5 + $0x734] ss:$8 sps:$4 sm:$0xff]   ;;  %v3560_v23 = vld [vmem:[#allocation5 + $0x730] ss:$8 sps:$4 sm:$0xff]   ;;  %v3568_v25 = vld [vmem:[#allocation5 + $0x744] ss:$8 sps:$4 sm:$0xff]  }
  0x43   :  { %v3563_v26 = vld [vmem:[#allocation5 + $0x140] ss:$8 sps:$4 sm:$0xff]   ;;  %v3571_v28 = vld [vmem:[#allocation5 + $0x154] ss:$8 sps:$4 sm:$0xff]   ;;  %v3593_v50 = vld [vmem:[#allocation5 + $0x190] ss:$8 sps:$4 sm:$0xff]   ;;  %p4083_p6 = pnand %p4082_p5, %p4076_p2 }
  0x44   :  { %2460 = vmatpush1.bf16.msra.mxu1 %v3489_v30  ;;  %v3566_v27 = vld [vmem:[#allocation5 + $0x740] ss:$8 sps:$4 sm:$0xff]   ;;  %v3574_v29 = vld [vmem:[#allocation5 + $0x754] ss:$8 sps:$4 sm:$0xff]   ;;  %v3569_v30 = vld [vmem:[#allocation5 + $0x150] ss:$8 sps:$4 sm:$0xff]  }
  0x45   :  { %2706 = vmatpush1.bf16.msra.mxu0 %v3490_v31  ;;  %2461 = vmatprep.subr.bf16.mxu1 %v3491_v32  ;;  %v3572_v31 = vld [vmem:[#allocation5 + $0x750] ss:$8 sps:$4 sm:$0xff]   ;;  %v3577_v32 = vld [vmem:[#allocation5 + $0x164] ss:$8 sps:$4 sm:$0xff]   ;;  %v3587_v46 = vld [vmem:[#allocation5 + $0x180] ss:$8 sps:$4 sm:$0xff]  }
  0x46   :  { %2707 = vmatprep.subr.bf16.mxu0 %v3493_v33  ;;  %v3580_v33 = vld [vmem:[#allocation5 + $0x764] ss:$8 sps:$4 sm:$0xff]   ;;  %v3595_v48 = vld [vmem:[#allocation5 + $0x194] ss:$8 sps:$4 sm:$0xff]   ;;  %v3623_v6 = vld [vmem:[#allocation5 + $0x1e0] ss:$8 sps:$4 sm:$0xff]  }
  0x47   :  { %v3604_v53 = vld [vmem:[#allocation5 + $0x7a4] ss:$8 sps:$4 sm:$0xff]  }
  0x48   :  { %2462 = vmatpush1.bf16.msra.mxu1 %v3495_v34  ;;  %v42_v34 = vld [vmem:[#allocation2 + $0x18] sm:$0xff]  ;;  %v3628_v5 = vld [vmem:[#allocation5 + $0x7e4] ss:$8 sps:$4 sm:$0xff]  }
  0x49   :  { %2708 = vmatpush1.bf16.msra.mxu0 %v3496_v35  ;;  %2463 = vmatprep.subr.bf16.mxu1 %v3497_v36  ;;  %v3575_v35 = vld [vmem:[#allocation5 + $0x160] ss:$8 sps:$4 sm:$0xff]   ;;  %v67_v36 = vpack.c.bf16 %v42_v34, %v42_v34  ;;  %v3653_v34 = vld [vmem:[#allocation5 + $0x230] ss:$8 sps:$4 sm:$0xff]  }
  0x4a   :  { %2709 = vmatprep.subr.bf16.mxu0 %v3499_v37  ;;  %v3578_v37 = vld [vmem:[#allocation5 + $0x760] ss:$8 sps:$4 sm:$0xff]  }
  0x4c   :  { %2464 = vmatpush1.bf16.msra.mxu1 %v3501_v38  ;;  %v54_v38 = vld [vmem:[#allocation2 + $0x78] sm:$0xff] }
  0x4d   :  { %2710 = vmatpush1.bf16.msra.mxu0 %v3502_v39  ;;  %2465 = vmatprep.subr.bf16.mxu1 %v3503_v40  ;;  %v3583_v39 = vld [vmem:[#allocation5 + $0x174] ss:$8 sps:$4 sm:$0xff]  }
  0x4e   :  { %2711 = vmatprep.subr.bf16.mxu0 %v3505_v41  ;;  %v3586_v40 = vld [vmem:[#allocation5 + $0x774] ss:$8 sps:$4 sm:$0xff]   ;;  %v79_v41 = vpack.c.bf16 %v54_v38, %v54_v38  ;;  %v3659_v38 = vld [vmem:[#allocation5 + $0x240] ss:$8 sps:$4 sm:$0xff]  }
  0x50   :  { %2466 = vmatpush1.bf16.msra.mxu1 %v3507_v42  ;;  %v3581_v42 = vld [vmem:[#allocation5 + $0x170] ss:$8 sps:$4 sm:$0xff]  }
  0x51   :  { %2712 = vmatpush1.bf16.msra.mxu0 %v3508_v43  ;;  %2467 = vmatprep.subr.bf16.mxu1 %v3509_v44  ;;  %v3584_v43 = vld [vmem:[#allocation5 + $0x770] ss:$8 sps:$4 sm:$0xff]   ;;  %v3589_v44 = vld [vmem:[#allocation5 + $0x184] ss:$8 sps:$4 sm:$0xff]  }
  0x52   :  { %2713 = vmatprep.subr.bf16.mxu0 %v3511_v45  ;;  %v3592_v45 = vld [vmem:[#allocation5 + $0x784] ss:$8 sps:$4 sm:$0xff]  }
  0x54   :  { %2468 = vmatpush1.bf16.msra.mxu1 %v3513_v47  ;;  %v3590_v47 = vld [vmem:[#allocation5 + $0x780] ss:$8 sps:$4 sm:$0xff]  }
  0x55   :  { %2714 = vmatpush1.bf16.msra.mxu0 %v3514_v49  ;;  %2469 = vmatprep.subr.bf16.mxu1 %v3515_v51  ;;  %v3598_v49 = vld [vmem:[#allocation5 + $0x794] ss:$8 sps:$4 sm:$0xff]   ;;  %v3596_v51 = vld [vmem:[#allocation5 + $0x790] ss:$8 sps:$4 sm:$0xff]  }
  0x56   :  { %2715 = vmatprep.subr.bf16.mxu0 %v3517_v52  ;;  %v3601_v52 = vld [vmem:[#allocation5 + $0x1a4] ss:$8 sps:$4 sm:$0xff]  }
  0x58   :  { %2470 = vmatpush1.bf16.msra.mxu1 %v3519_v54  ;;  %v3599_v54 = vld [vmem:[#allocation5 + $0x1a0] ss:$8 sps:$4 sm:$0xff]  }
  0x59   :  { %2716 = vmatpush1.bf16.msra.mxu0 %v3520_v55  ;;  %2471 = vmatprep.subr.bf16.mxu1 %v3521_v56  ;;  %v3602_v55 = vld [vmem:[#allocation5 + $0x7a0] ss:$8 sps:$4 sm:$0xff]   ;;  %v3607_v56 = vld [vmem:[#allocation5 + $0x1b4] ss:$8 sps:$4 sm:$0xff]  }
  0x5a   :  { %2717 = vmatprep.subr.bf16.mxu0 %v3523_v57  ;;  %v3610_v57 = vld [vmem:[#allocation5 + $0x7b4] ss:$8 sps:$4 sm:$0xff]  }
  0x5c   :  { %2472 = vmatpush1.bf16.msra.mxu1 %v3525_v58  ;;  %v3605_v58 = vld [vmem:[#allocation5 + $0x1b0] ss:$8 sps:$4 sm:$0xff]  }
  0x5d   :  { %2718 = vmatpush1.bf16.msra.mxu0 %v3526_v59  ;;  %2473 = vmatprep.subr.bf16.mxu1 %v3527_v60  ;;  %v3608_v59 = vld [vmem:[#allocation5 + $0x7b0] ss:$8 sps:$4 sm:$0xff]   ;;  %v3613_v60 = vld [vmem:[#allocation5 + $0x1c4] ss:$8 sps:$4 sm:$0xff]  }
  0x5e   :  { %2719 = vmatprep.subr.bf16.mxu0 %v3529_v61  ;;  %v3616_v61 = vld [vmem:[#allocation5 + $0x7c4] ss:$8 sps:$4 sm:$0xff]  }
  0x60   :  { %2474 = vmatpush1.bf16.msra.mxu1 %v3531_v62  ;;  %v3611_v62 = vld [vmem:[#allocation5 + $0x1c0] ss:$8 sps:$4 sm:$0xff]  }
  0x61   :  { %2720 = vmatpush1.bf16.msra.mxu0 %v3532_v63  ;;  %2475 = vmatprep.subr.bf16.mxu1 %v3533_v0  ;;  %v3614_v63 = vld [vmem:[#allocation5 + $0x7c0] ss:$8 sps:$4 sm:$0xff]   ;;  %v3619_v0 = vld [vmem:[#allocation5 + $0x1d4] ss:$8 sps:$4 sm:$0xff]  }
  0x62   :  { %2721 = vmatprep.subr.bf16.mxu0 %v3535_v1  ;;  %v3622_v1 = vld [vmem:[#allocation5 + $0x7d4] ss:$8 sps:$4 sm:$0xff]  }
  0x64   :  { %2476 = vmatpush1.bf16.msra.mxu1 %v3537_v2  ;;  %v3617_v2 = vld [vmem:[#allocation5 + $0x1d0] ss:$8 sps:$4 sm:$0xff]  }
  0x65   :  { %2722 = vmatpush1.bf16.msra.mxu0 %v3538_v3  ;;  %2486 = vmatprep.subr.bf16.mxu1 %v3541_v4  ;;  %v3620_v3 = vld [vmem:[#allocation5 + $0x7d0] ss:$8 sps:$4 sm:$0xff]   ;;  %v3625_v4 = vld [vmem:[#allocation5 + $0x1e4] ss:$8 sps:$4 sm:$0xff]  }
  0x66   :  { %2732 = vmatprep.subr.bf16.mxu0 %v3544_v7  ;;  %v3626_v7 = vld [vmem:[#allocation5 + $0x7e0] ss:$8 sps:$4 sm:$0xff]  }
  0x67   :  { %2478 = vmatmul.mubr.bf16.vlgmr.msra.gmra.mrb[0].mxu1 %v64_v10  ;;  %v3629_v10 = vld [vmem:[#allocation5 + $0x1f0] ss:$8 sps:$4 sm:$0xff]  }
  0x68   :  { %2724 = vmatmul.mubr.bf16.vlgmr.msra.gmra.mrb[0].mxu0 %v76_v11  ;;  %2487 = vmatpush1.bf16.msra.mxu1 %v3539_v8  ;;  %v3631_v8 = vld [vmem:[#allocation5 + $0x1f4] ss:$8 sps:$4 sm:$0xff]   ;;  %v3632_v11 = vld [vmem:[#allocation5 + $0x7f0] ss:$8 sps:$4 sm:$0xff]  }
  0x69   :  { %2733 = vmatpush1.bf16.msra.mxu0 %v3542_v9  ;;  %2488 = vmatprep.subr.bf16.mxu1 %v3547_v12  ;;  %v3634_v9 = vld [vmem:[#allocation5 + $0x7f4] ss:$8 sps:$4 sm:$0xff]   ;;  %v3637_v12 = vld [vmem:[#allocation5 + $0x204] ss:$8 sps:$4 sm:$0xff]  }
  0x6a   :  { %2734 = vmatprep.subr.bf16.mxu0 %v3550_v13  ;;  %2518 = vmatprep.mubr.bf16.mxu1 %v67_v36  ;;  %v41_v13 = vld [vmem:[#allocation2 + $0x10] sm:$0xff] }
  0x6b   :  { %2764 = vmatprep.mubr.bf16.mxu0 %v79_v41  ;;  %v3661_v36 = vld [vmem:[#allocation5 + $0x244] ss:$8 sps:$4 sm:$0xff]   ;;  %v3670_v41 = vld [vmem:[#allocation5 + $0x854] ss:$8 sps:$4 sm:$0xff]  }
  0x6c   :  { %2489 = vmatpush1.bf16.msra.mxu1 %v3545_v14  ;;  %v53_v14 = vld [vmem:[#allocation2 + $0x70] sm:$0xff] }
  0x6d   :  { %2735 = vmatpush1.bf16.msra.mxu0 %v3548_v15  ;;  %2490 = vmatprep.subr.bf16.mxu1 %v3553_v16  ;;  %v3640_v15 = vld [vmem:[#allocation5 + $0x804] ss:$8 sps:$4 sm:$0xff]   ;;  %v3635_v16 = vld [vmem:[#allocation5 + $0x200] ss:$8 sps:$4 sm:$0xff]  }
  0x6e   :  { %2736 = vmatprep.subr.bf16.mxu0 %v3556_v17  ;;  %v3638_v17 = vld [vmem:[#allocation5 + $0x800] ss:$8 sps:$4 sm:$0xff]  }
  0x70   :  { %2491 = vmatpush1.bf16.msra.mxu1 %v3551_v18  ;;  %v66_v18 = vpack.c.bf16 %v41_v13, %v41_v13  ;;  %v3724_v13 = vld [vmem:[#allocation5 + $0x8e4] ss:$8 sps:$4 sm:$0xff]  }
  0x71   :  { %2737 = vmatpush1.bf16.msra.mxu0 %v3554_v19  ;;  %2492 = vmatprep.subr.bf16.mxu1 %v3559_v20  ;;  %v78_v19 = vpack.c.bf16 %v53_v14, %v53_v14  ;;  %v3643_v20 = vld [vmem:[#allocation5 + $0x214] ss:$8 sps:$4 sm:$0xff]   ;;  %v3719_v14 = vld [vmem:[#allocation5 + $0x2e0] ss:$8 sps:$4 sm:$0xff]  }
  0x72   :  { %2738 = vmatprep.subr.bf16.mxu0 %v3562_v21  ;;  %v3646_v21 = vld [vmem:[#allocation5 + $0x814] ss:$8 sps:$4 sm:$0xff]  }
  0x74   :  { %2493 = vmatpush1.bf16.msra.mxu1 %v3557_v22  ;;  %v44_v22 = vld [vmem:[#allocation2 + $0x28] sm:$0xff] }
  0x75   :  { %2739 = vmatpush1.bf16.msra.mxu0 %v3560_v23  ;;  %2494 = vmatprep.subr.bf16.mxu1 %v3565_v24  ;;  %v3641_v23 = vld [vmem:[#allocation5 + $0x210] ss:$8 sps:$4 sm:$0xff]   ;;  %v69_v24 = vpack.c.bf16 %v44_v22, %v44_v22 }
  0x76   :  { %2740 = vmatprep.subr.bf16.mxu0 %v3568_v25  ;;  %v3644_v25 = vld [vmem:[#allocation5 + $0x810] ss:$8 sps:$4 sm:$0xff]  }
  0x77   :  { %v55_v22 = vld [vmem:[#allocation2 + $0x80] sm:$0xff] }
  0x78   :  { %2495 = vmatpush1.bf16.msra.mxu1 %v3563_v26  ;;  %v56_v26 = vld [vmem:[#allocation2 + $0x88] sm:$0xff] }
  0x79   :  { %2741 = vmatpush1.bf16.msra.mxu0 %v3566_v27  ;;  %2496 = vmatprep.subr.bf16.mxu1 %v3571_v28  ;;  %v3649_v27 = vld [vmem:[#allocation5 + $0x224] ss:$8 sps:$4 sm:$0xff]  }
  0x7a   :  { %2742 = vmatprep.subr.bf16.mxu0 %v3574_v29  ;;  %v3652_v28 = vld [vmem:[#allocation5 + $0x824] ss:$8 sps:$4 sm:$0xff]   ;;  %v81_v29 = vpack.c.bf16 %v56_v26, %v56_v26 }
  0x7c   :  { %2497 = vmatpush1.bf16.msra.mxu1 %v3569_v30  ;;  %v3647_v30 = vld [vmem:[#allocation5 + $0x220] ss:$8 sps:$4 sm:$0xff]  }
  0x7d   :  { %2743 = vmatpush1.bf16.msra.mxu0 %v3572_v31  ;;  %2498 = vmatprep.subr.bf16.mxu1 %v3577_v32  ;;  %v3650_v31 = vld [vmem:[#allocation5 + $0x820] ss:$8 sps:$4 sm:$0xff]   ;;  %v3655_v32 = vld [vmem:[#allocation5 + $0x234] ss:$8 sps:$4 sm:$0xff]  }
  0x7e   :  { %2744 = vmatprep.subr.bf16.mxu0 %v3580_v33  ;;  %v3658_v33 = vld [vmem:[#allocation5 + $0x834] ss:$8 sps:$4 sm:$0xff]  }
  0x80   :  { %2499 = vmatpush1.bf16.msra.mxu1 %v3575_v35  ;;  %v3656_v35 = vld [vmem:[#allocation5 + $0x830] ss:$8 sps:$4 sm:$0xff]  }
  0x81   :  { %2745 = vmatpush1.bf16.msra.mxu0 %v3578_v37  ;;  %2500 = vmatprep.subr.bf16.mxu1 %v3583_v39  ;;  %v3664_v37 = vld [vmem:[#allocation5 + $0x844] ss:$8 sps:$4 sm:$0xff]   ;;  %v3662_v39 = vld [vmem:[#allocation5 + $0x840] ss:$8 sps:$4 sm:$0xff]  }
  0x82   :  { %2746 = vmatprep.subr.bf16.mxu0 %v3586_v40  ;;  %v3667_v40 = vld [vmem:[#allocation5 + $0x254] ss:$8 sps:$4 sm:$0xff]  }
  0x84   :  { %2501 = vmatpush1.bf16.msra.mxu1 %v3581_v42  ;;  %v3665_v42 = vld [vmem:[#allocation5 + $0x250] ss:$8 sps:$4 sm:$0xff]  }
  0x85   :  { %2747 = vmatpush1.bf16.msra.mxu0 %v3584_v43  ;;  %2502 = vmatprep.subr.bf16.mxu1 %v3589_v44  ;;  %v3668_v43 = vld [vmem:[#allocation5 + $0x850] ss:$8 sps:$4 sm:$0xff]   ;;  %v3673_v44 = vld [vmem:[#allocation5 + $0x264] ss:$8 sps:$4 sm:$0xff]  }
  0x86   :  { %2748 = vmatprep.subr.bf16.mxu0 %v3592_v45  ;;  %v3676_v45 = vld [vmem:[#allocation5 + $0x864] ss:$8 sps:$4 sm:$0xff]  }
  0x88   :  { %2503 = vmatpush1.bf16.msra.mxu1 %v3587_v46  ;;  %v3671_v46 = vld [vmem:[#allocation5 + $0x260] ss:$8 sps:$4 sm:$0xff]  }
  0x89   :  { %2749 = vmatpush1.bf16.msra.mxu0 %v3590_v47  ;;  %2504 = vmatprep.subr.bf16.mxu1 %v3595_v48  ;;  %v3674_v47 = vld [vmem:[#allocation5 + $0x860] ss:$8 sps:$4 sm:$0xff]   ;;  %v3679_v48 = vld [vmem:[#allocation5 + $0x274] ss:$8 sps:$4 sm:$0xff]  }
  0x8a   :  { %2750 = vmatprep.subr.bf16.mxu0 %v3598_v49  ;;  %v3682_v49 = vld [vmem:[#allocation5 + $0x874] ss:$8 sps:$4 sm:$0xff]  }
  0x8c   :  { %2505 = vmatpush1.bf16.msra.mxu1 %v3593_v50  ;;  %v3677_v50 = vld [vmem:[#allocation5 + $0x270] ss:$8 sps:$4 sm:$0xff]  }
  0x8d   :  { %2751 = vmatpush1.bf16.msra.mxu0 %v3596_v51  ;;  %2506 = vmatprep.subr.bf16.mxu1 %v3601_v52  ;;  %v3680_v51 = vld [vmem:[#allocation5 + $0x870] ss:$8 sps:$4 sm:$0xff]   ;;  %v3685_v52 = vld [vmem:[#allocation5 + $0x284] ss:$8 sps:$4 sm:$0xff]  }
  0x8e   :  { %2752 = vmatprep.subr.bf16.mxu0 %v3604_v53  ;;  %v3688_v53 = vld [vmem:[#allocation5 + $0x884] ss:$8 sps:$4 sm:$0xff]  }
  0x90   :  { %2507 = vmatpush1.bf16.msra.mxu1 %v3599_v54  ;;  %v3683_v54 = vld [vmem:[#allocation5 + $0x280] ss:$8 sps:$4 sm:$0xff]  }
  0x91   :  { %2753 = vmatpush1.bf16.msra.mxu0 %v3602_v55  ;;  %2508 = vmatprep.subr.bf16.mxu1 %v3607_v56  ;;  %v3686_v55 = vld [vmem:[#allocation5 + $0x880] ss:$8 sps:$4 sm:$0xff]   ;;  %v3691_v56 = vld [vmem:[#allocation5 + $0x294] ss:$8 sps:$4 sm:$0xff]  }
  0x92   :  { %2754 = vmatprep.subr.bf16.mxu0 %v3610_v57  ;;  %v3694_v57 = vld [vmem:[#allocation5 + $0x894] ss:$8 sps:$4 sm:$0xff]  }
  0x94   :  { %2509 = vmatpush1.bf16.msra.mxu1 %v3605_v58  ;;  %v3689_v58 = vld [vmem:[#allocation5 + $0x290] ss:$8 sps:$4 sm:$0xff]  }
  0x95   :  { %2755 = vmatpush1.bf16.msra.mxu0 %v3608_v59  ;;  %2510 = vmatprep.subr.bf16.mxu1 %v3613_v60  ;;  %v3692_v59 = vld [vmem:[#allocation5 + $0x890] ss:$8 sps:$4 sm:$0xff]   ;;  %v3697_v60 = vld [vmem:[#allocation5 + $0x2a4] ss:$8 sps:$4 sm:$0xff]  }
  0x96   :  { %2756 = vmatprep.subr.bf16.mxu0 %v3616_v61  ;;  %v3700_v61 = vld [vmem:[#allocation5 + $0x8a4] ss:$8 sps:$4 sm:$0xff]  }
  0x98   :  { %2511 = vmatpush1.bf16.msra.mxu1 %v3611_v62  ;;  %v3695_v62 = vld [vmem:[#allocation5 + $0x2a0] ss:$8 sps:$4 sm:$0xff]  }
  0x99   :  { %2757 = vmatpush1.bf16.msra.mxu0 %v3614_v63  ;;  %2512 = vmatprep.subr.bf16.mxu1 %v3619_v0  ;;  %v3698_v63 = vld [vmem:[#allocation5 + $0x8a0] ss:$8 sps:$4 sm:$0xff]   ;;  %v3703_v0 = vld [vmem:[#allocation5 + $0x2b4] ss:$8 sps:$4 sm:$0xff]  }
  0x9a   :  { %2758 = vmatprep.subr.bf16.mxu0 %v3622_v1  ;;  %v3706_v1 = vld [vmem:[#allocation5 + $0x8b4] ss:$8 sps:$4 sm:$0xff]  }
  0x9c   :  { %2513 = vmatpush1.bf16.msra.mxu1 %v3617_v2  ;;  %v3701_v2 = vld [vmem:[#allocation5 + $0x2b0] ss:$8 sps:$4 sm:$0xff]  }
  0x9d   :  { %2759 = vmatpush1.bf16.msra.mxu0 %v3620_v3  ;;  %2514 = vmatprep.subr.bf16.mxu1 %v3625_v4  ;;  %v3704_v3 = vld [vmem:[#allocation5 + $0x8b0] ss:$8 sps:$4 sm:$0xff]   ;;  %v3709_v4 = vld [vmem:[#allocation5 + $0x2c4] ss:$8 sps:$4 sm:$0xff]  }
  0x9e   :  { %2760 = vmatprep.subr.bf16.mxu0 %v3628_v5  ;;  %v3712_v5 = vld [vmem:[#allocation5 + $0x8c4] ss:$8 sps:$4 sm:$0xff]  }
  0xa0   :  { %2515 = vmatpush1.bf16.msra.mxu1 %v3623_v6  ;;  %v3707_v6 = vld [vmem:[#allocation5 + $0x2c0] ss:$8 sps:$4 sm:$0xff]  }
  0xa1   :  { %2761 = vmatpush1.bf16.msra.mxu0 %v3626_v7  ;;  %2516 = vmatprep.subr.bf16.mxu1 %v3631_v8  ;;  %v3710_v7 = vld [vmem:[#allocation5 + $0x8c0] ss:$8 sps:$4 sm:$0xff]   ;;  %v3715_v8 = vld [vmem:[#allocation5 + $0x2d4] ss:$8 sps:$4 sm:$0xff]  }
  0xa2   :  { %2762 = vmatprep.subr.bf16.mxu0 %v3634_v9  ;;  %v3718_v9 = vld [vmem:[#allocation5 + $0x8d4] ss:$8 sps:$4 sm:$0xff]  }
  0xa4   :  { %2517 = vmatpush1.bf16.msra.mxu1 %v3629_v10  ;;  %v3713_v10 = vld [vmem:[#allocation5 + $0x2d0] ss:$8 sps:$4 sm:$0xff]  }
  0xa5   :  { %2763 = vmatpush1.bf16.msra.mxu0 %v3632_v11  ;;  %2527 = vmatprep.subr.bf16.mxu1 %v3637_v12  ;;  %v3716_v11 = vld [vmem:[#allocation5 + $0x8d0] ss:$8 sps:$4 sm:$0xff]   ;;  %v3721_v12 = vld [vmem:[#allocation5 + $0x2e4] ss:$8 sps:$4 sm:$0xff]  }
  0xa6   :  { %2773 = vmatprep.subr.bf16.mxu0 %v3640_v15  ;;  %v3722_v15 = vld [vmem:[#allocation5 + $0x8e0] ss:$8 sps:$4 sm:$0xff]  }
  0xa7   :  { %2519 = vmatmul.mubr.bf16.vlgmr.msra.gmra.mrb[0].mxu1 %v66_v18  ;;  %v3725_v18 = vld [vmem:[#allocation5 + $0x2f0] ss:$8 sps:$4 sm:$0xff]  }
  0xa8   :  { %2765 = vmatmul.mubr.bf16.vlgmr.msra.gmra.mrb[0].mxu0 %v78_v19  ;;  %2528 = vmatpush1.bf16.msra.mxu1 %v3635_v16  ;;  %v3727_v16 = vld [vmem:[#allocation5 + $0x2f4] ss:$8 sps:$4 sm:$0xff]   ;;  %v3728_v19 = vld [vmem:[#allocation5 + $0x8f0] ss:$8 sps:$4 sm:$0xff]  }
  0xa9   :  { %2774 = vmatpush1.bf16.msra.mxu0 %v3638_v17  ;;  %2529 = vmatprep.subr.bf16.mxu1 %v3643_v20  ;;  %v3730_v17 = vld [vmem:[#allocation5 + $0x8f4] ss:$8 sps:$4 sm:$0xff]   ;;  %v3733_v20 = vld [vmem:[#allocation5 + $0x304] ss:$8 sps:$4 sm:$0xff]  }
  0xaa   :  { %2775 = vmatprep.subr.bf16.mxu0 %v3646_v21  ;;  %2559 = vmatprep.mubr.bf16.mxu1 %v69_v24  ;;  %v43_v21 = vld [vmem:[#allocation2 + $0x20] sm:$0xff]  ;;  %v3731_v24 = vld [vmem:[#allocation5 + $0x300] ss:$8 sps:$4 sm:$0xff]  }
  0xab   :  { %2805 = vmatprep.mubr.bf16.mxu0 %v81_v29  ;;  %v68_v26 = vpack.c.bf16 %v43_v21, %v43_v21  ;;  %v58_v29 = vld [vmem:[#allocation2 + $0x98] sm:$0xff]  ;;  %v3820_v21 = vld [vmem:[#allocation5 + $0x9e4] ss:$8 sps:$4 sm:$0xff]  }
  0xac   :  { %2530 = vmatpush1.bf16.msra.mxu1 %v3641_v23  ;;  %v3736_v23 = vld [vmem:[#allocation5 + $0x904] ss:$8 sps:$4 sm:$0xff]  }
  0xad   :  { %2776 = vmatpush1.bf16.msra.mxu0 %v3644_v25  ;;  %2531 = vmatprep.subr.bf16.mxu1 %v3649_v27  ;;  %v3734_v25 = vld [vmem:[#allocation5 + $0x900] ss:$8 sps:$4 sm:$0xff]   ;;  %v80_v27 = vpack.c.bf16 %v55_v22, %v55_v22 }
  0xae   :  { %2777 = vmatprep.subr.bf16.mxu0 %v3652_v28  ;;  %v46_v28 = vld [vmem:[#allocation2 + $0x38] sm:$0xff]  ;;  %v3815_v22 = vld [vmem:[#allocation5 + $0x3e0] ss:$8 sps:$4 sm:$0xff]  }
  0xb0   :  { %2532 = vmatpush1.bf16.msra.mxu1 %v3647_v30  ;;  %v3739_v30 = vld [vmem:[#allocation5 + $0x314] ss:$8 sps:$4 sm:$0xff]  }
  0xb1   :  { %2778 = vmatpush1.bf16.msra.mxu0 %v3650_v31  ;;  %2533 = vmatprep.subr.bf16.mxu1 %v3655_v32  ;;  %v3742_v31 = vld [vmem:[#allocation5 + $0x914] ss:$8 sps:$4 sm:$0xff]   ;;  %v71_v32 = vpack.c.bf16 %v46_v28, %v46_v28  ;;  %v3829_v28 = vld [vmem:[#allocation5 + $0x404] ss:$8 sps:$4 sm:$0xff]  }
  0xb2   :  { %2779 = vmatprep.subr.bf16.mxu0 %v3658_v33  ;;  %v83_v33 = vpack.c.bf16 %v58_v29, %v58_v29  ;;  %v45_v29 = vld [vmem:[#allocation2 + $0x30] sm:$0xff] }
  0xb4   :  { %2534 = vmatpush1.bf16.msra.mxu1 %v3653_v34  ;;  %v3737_v34 = vld [vmem:[#allocation5 + $0x310] ss:$8 sps:$4 sm:$0xff]  }
  0xb5   :  { %2780 = vmatpush1.bf16.msra.mxu0 %v3656_v35  ;;  %2535 = vmatprep.subr.bf16.mxu1 %v3661_v36  ;;  %v3740_v35 = vld [vmem:[#allocation5 + $0x910] ss:$8 sps:$4 sm:$0xff]   ;;  %v3745_v36 = vld [vmem:[#allocation5 + $0x324] ss:$8 sps:$4 sm:$0xff]  }
  0xb6   :  { %2781 = vmatprep.subr.bf16.mxu0 %v3664_v37  ;;  %v3748_v37 = vld [vmem:[#allocation5 + $0x924] ss:$8 sps:$4 sm:$0xff]  }
  0xb8   :  { %2536 = vmatpush1.bf16.msra.mxu1 %v3659_v38  ;;  %v3743_v38 = vld [vmem:[#allocation5 + $0x320] ss:$8 sps:$4 sm:$0xff]  }
  0xb9   :  { %2782 = vmatpush1.bf16.msra.mxu0 %v3662_v39  ;;  %2537 = vmatprep.subr.bf16.mxu1 %v3667_v40  ;;  %v3746_v39 = vld [vmem:[#allocation5 + $0x920] ss:$8 sps:$4 sm:$0xff]   ;;  %v3751_v40 = vld [vmem:[#allocation5 + $0x334] ss:$8 sps:$4 sm:$0xff]  }
  0xba   :  { %2783 = vmatprep.subr.bf16.mxu0 %v3670_v41  ;;  %v3754_v41 = vld [vmem:[#allocation5 + $0x934] ss:$8 sps:$4 sm:$0xff]  }
  0xbc   :  { %2538 = vmatpush1.bf16.msra.mxu1 %v3665_v42  ;;  %v3749_v42 = vld [vmem:[#allocation5 + $0x330] ss:$8 sps:$4 sm:$0xff]  }
  0xbd   :  { %2784 = vmatpush1.bf16.msra.mxu0 %v3668_v43  ;;  %2539 = vmatprep.subr.bf16.mxu1 %v3673_v44  ;;  %v3752_v43 = vld [vmem:[#allocation5 + $0x930] ss:$8 sps:$4 sm:$0xff]   ;;  %v3757_v44 = vld [vmem:[#allocation5 + $0x344] ss:$8 sps:$4 sm:$0xff]  }
  0xbe   :  { %2785 = vmatprep.subr.bf16.mxu0 %v3676_v45  ;;  %v3760_v45 = vld [vmem:[#allocation5 + $0x944] ss:$8 sps:$4 sm:$0xff]  }
  0xc0   :  { %2540 = vmatpush1.bf16.msra.mxu1 %v3671_v46  ;;  %v3755_v46 = vld [vmem:[#allocation5 + $0x340] ss:$8 sps:$4 sm:$0xff]  }
  0xc1   :  { %2786 = vmatpush1.bf16.msra.mxu0 %v3674_v47  ;;  %2541 = vmatprep.subr.bf16.mxu1 %v3679_v48  ;;  %v3758_v47 = vld [vmem:[#allocation5 + $0x940] ss:$8 sps:$4 sm:$0xff]   ;;  %v3763_v48 = vld [vmem:[#allocation5 + $0x354] ss:$8 sps:$4 sm:$0xff]  }
  0xc2   :  { %2787 = vmatprep.subr.bf16.mxu0 %v3682_v49  ;;  %v3766_v49 = vld [vmem:[#allocation5 + $0x954] ss:$8 sps:$4 sm:$0xff]  }
  0xc4   :  { %2542 = vmatpush1.bf16.msra.mxu1 %v3677_v50  ;;  %v3761_v50 = vld [vmem:[#allocation5 + $0x350] ss:$8 sps:$4 sm:$0xff]  }
  0xc5   :  { %2788 = vmatpush1.bf16.msra.mxu0 %v3680_v51  ;;  %2543 = vmatprep.subr.bf16.mxu1 %v3685_v52  ;;  %v3764_v51 = vld [vmem:[#allocation5 + $0x950] ss:$8 sps:$4 sm:$0xff]   ;;  %v3769_v52 = vld [vmem:[#allocation5 + $0x364] ss:$8 sps:$4 sm:$0xff]  }
  0xc6   :  { %2789 = vmatprep.subr.bf16.mxu0 %v3688_v53  ;;  %v3772_v53 = vld [vmem:[#allocation5 + $0x964] ss:$8 sps:$4 sm:$0xff]  }
  0xc8   :  { %2544 = vmatpush1.bf16.msra.mxu1 %v3683_v54  ;;  %v3767_v54 = vld [vmem:[#allocation5 + $0x360] ss:$8 sps:$4 sm:$0xff]  }
  0xc9   :  { %2790 = vmatpush1.bf16.msra.mxu0 %v3686_v55  ;;  %2545 = vmatprep.subr.bf16.mxu1 %v3691_v56  ;;  %v3770_v55 = vld [vmem:[#allocation5 + $0x960] ss:$8 sps:$4 sm:$0xff]   ;;  %v3775_v56 = vld [vmem:[#allocation5 + $0x374] ss:$8 sps:$4 sm:$0xff]  }
  0xca   :  { %2791 = vmatprep.subr.bf16.mxu0 %v3694_v57  ;;  %v3778_v57 = vld [vmem:[#allocation5 + $0x974] ss:$8 sps:$4 sm:$0xff]  }
  0xcc   :  { %2546 = vmatpush1.bf16.msra.mxu1 %v3689_v58  ;;  %v3773_v58 = vld [vmem:[#allocation5 + $0x370] ss:$8 sps:$4 sm:$0xff]  }
  0xcd   :  { %2792 = vmatpush1.bf16.msra.mxu0 %v3692_v59  ;;  %2547 = vmatprep.subr.bf16.mxu1 %v3697_v60  ;;  %v3776_v59 = vld [vmem:[#allocation5 + $0x970] ss:$8 sps:$4 sm:$0xff]   ;;  %v3781_v60 = vld [vmem:[#allocation5 + $0x384] ss:$8 sps:$4 sm:$0xff]  }
  0xce   :  { %2793 = vmatprep.subr.bf16.mxu0 %v3700_v61  ;;  %v3784_v61 = vld [vmem:[#allocation5 + $0x984] ss:$8 sps:$4 sm:$0xff]  }
  0xd0   :  { %2548 = vmatpush1.bf16.msra.mxu1 %v3695_v62  ;;  %v3779_v62 = vld [vmem:[#allocation5 + $0x380] ss:$8 sps:$4 sm:$0xff]  }
  0xd1   :  { %2794 = vmatpush1.bf16.msra.mxu0 %v3698_v63  ;;  %2549 = vmatprep.subr.bf16.mxu1 %v3703_v0  ;;  %v3782_v63 = vld [vmem:[#allocation5 + $0x980] ss:$8 sps:$4 sm:$0xff]   ;;  %v3787_v0 = vld [vmem:[#allocation5 + $0x394] ss:$8 sps:$4 sm:$0xff]  }
  0xd2   :  { %2795 = vmatprep.subr.bf16.mxu0 %v3706_v1  ;;  %v3790_v1 = vld [vmem:[#allocation5 + $0x994] ss:$8 sps:$4 sm:$0xff]  }
  0xd4   :  { %2550 = vmatpush1.bf16.msra.mxu1 %v3701_v2  ;;  %v3785_v2 = vld [vmem:[#allocation5 + $0x390] ss:$8 sps:$4 sm:$0xff]  }
  0xd5   :  { %2796 = vmatpush1.bf16.msra.mxu0 %v3704_v3  ;;  %2551 = vmatprep.subr.bf16.mxu1 %v3709_v4  ;;  %v3788_v3 = vld [vmem:[#allocation5 + $0x990] ss:$8 sps:$4 sm:$0xff]   ;;  %v3793_v4 = vld [vmem:[#allocation5 + $0x3a4] ss:$8 sps:$4 sm:$0xff]  }
  0xd6   :  { %2797 = vmatprep.subr.bf16.mxu0 %v3712_v5  ;;  %v3796_v5 = vld [vmem:[#allocation5 + $0x9a4] ss:$8 sps:$4 sm:$0xff]  }
  0xd8   :  { %2552 = vmatpush1.bf16.msra.mxu1 %v3707_v6  ;;  %v3791_v6 = vld [vmem:[#allocation5 + $0x3a0] ss:$8 sps:$4 sm:$0xff]  }
  0xd9   :  { %2798 = vmatpush1.bf16.msra.mxu0 %v3710_v7  ;;  %2553 = vmatprep.subr.bf16.mxu1 %v3715_v8  ;;  %v3794_v7 = vld [vmem:[#allocation5 + $0x9a0] ss:$8 sps:$4 sm:$0xff]   ;;  %v3799_v8 = vld [vmem:[#allocation5 + $0x3b4] ss:$8 sps:$4 sm:$0xff]  }
  0xda   :  { %2799 = vmatprep.subr.bf16.mxu0 %v3718_v9  ;;  %v3802_v9 = vld [vmem:[#allocation5 + $0x9b4] ss:$8 sps:$4 sm:$0xff]  }
  0xdc   :  { %2554 = vmatpush1.bf16.msra.mxu1 %v3713_v10  ;;  %v3797_v10 = vld [vmem:[#allocation5 + $0x3b0] ss:$8 sps:$4 sm:$0xff]  }
  0xdd   :  { %2800 = vmatpush1.bf16.msra.mxu0 %v3716_v11  ;;  %2555 = vmatprep.subr.bf16.mxu1 %v3721_v12  ;;  %v3800_v11 = vld [vmem:[#allocation5 + $0x9b0] ss:$8 sps:$4 sm:$0xff]   ;;  %v3805_v12 = vld [vmem:[#allocation5 + $0x3c4] ss:$8 sps:$4 sm:$0xff]  }
  0xde   :  { %2801 = vmatprep.subr.bf16.mxu0 %v3724_v13  ;;  %v3808_v13 = vld [vmem:[#allocation5 + $0x9c4] ss:$8 sps:$4 sm:$0xff]  }
  0xe0   :  { %2556 = vmatpush1.bf16.msra.mxu1 %v3719_v14  ;;  %v3803_v14 = vld [vmem:[#allocation5 + $0x3c0] ss:$8 sps:$4 sm:$0xff]  }
  0xe1   :  { %2802 = vmatpush1.bf16.msra.mxu0 %v3722_v15  ;;  %2557 = vmatprep.subr.bf16.mxu1 %v3727_v16  ;;  %v3806_v15 = vld [vmem:[#allocation5 + $0x9c0] ss:$8 sps:$4 sm:$0xff]   ;;  %v3811_v16 = vld [vmem:[#allocation5 + $0x3d4] ss:$8 sps:$4 sm:$0xff]  }
  0xe2   :  { %2803 = vmatprep.subr.bf16.mxu0 %v3730_v17  ;;  %v3814_v17 = vld [vmem:[#allocation5 + $0x9d4] ss:$8 sps:$4 sm:$0xff]  }
  0xe4   :  { %2558 = vmatpush1.bf16.msra.mxu1 %v3725_v18  ;;  %v3809_v18 = vld [vmem:[#allocation5 + $0x3d0] ss:$8 sps:$4 sm:$0xff]  }
  0xe5   :  { %2804 = vmatpush1.bf16.msra.mxu0 %v3728_v19  ;;  %2568 = vmatprep.subr.bf16.mxu1 %v3733_v20  ;;  %v3812_v19 = vld [vmem:[#allocation5 + $0x9d0] ss:$8 sps:$4 sm:$0xff]   ;;  %v3817_v20 = vld [vmem:[#allocation5 + $0x3e4] ss:$8 sps:$4 sm:$0xff]  }
  0xe6   :  { %2814 = vmatprep.subr.bf16.mxu0 %v3736_v23  ;;  %v3818_v23 = vld [vmem:[#allocation5 + $0x9e0] ss:$8 sps:$4 sm:$0xff]  }
  0xe7   :  { %2560 = vmatmul.mubr.bf16.vlgmr.msra.gmra.mrb[0].mxu1 %v68_v26  ;;  %v3821_v26 = vld [vmem:[#allocation5 + $0x3f0] ss:$8 sps:$4 sm:$0xff]  }
  0xe8   :  { %2806 = vmatmul.mubr.bf16.vlgmr.msra.gmra.mrb[0].mxu0 %v80_v27  ;;  %2569 = vmatpush1.bf16.msra.mxu1 %v3731_v24  ;;  %v3823_v24 = vld [vmem:[#allocation5 + $0x3f4] ss:$8 sps:$4 sm:$0xff]   ;;  %v3824_v27 = vld [vmem:[#allocation5 + $0x9f0] ss:$8 sps:$4 sm:$0xff]  }
  0xe9   :  { %2815 = vmatpush1.bf16.msra.mxu0 %v3734_v25  ;;  %2570 = vmatprep.subr.bf16.mxu1 %v3739_v30  ;;  %v3826_v25 = vld [vmem:[#allocation5 + $0x9f4] ss:$8 sps:$4 sm:$0xff]   ;;  %v57_v30 = vld [vmem:[#allocation2 + $0x90] sm:$0xff] }
  0xea   :  { %2816 = vmatprep.subr.bf16.mxu0 %v3742_v31  ;;  %2600 = vmatprep.mubr.bf16.mxu1 %v71_v32  ;;  %v3832_v31 = vld [vmem:[#allocation5 + $0xa04] ss:$8 sps:$4 sm:$0xff]   ;;  %v3827_v32 = vld [vmem:[#allocation5 + $0x400] ss:$8 sps:$4 sm:$0xff]  }
  0xeb   :  { %2846 = vmatprep.mubr.bf16.mxu0 %v83_v33  ;;  %v3830_v33 = vld [vmem:[#allocation5 + $0xa00] ss:$8 sps:$4 sm:$0xff]  }
  0xec   :  { %2571 = vmatpush1.bf16.msra.mxu1 %v3737_v34  ;;  %v70_v34 = vpack.c.bf16 %v45_v29, %v45_v29  ;;  %v3916_v29 = vld [vmem:[#allocation5 + $0xae4] ss:$8 sps:$4 sm:$0xff]  }
  0xed   :  { %2817 = vmatpush1.bf16.msra.mxu0 %v3740_v35  ;;  %2572 = vmatprep.subr.bf16.mxu1 %v3745_v36  ;;  %v82_v35 = vpack.c.bf16 %v57_v30, %v57_v30  ;;  %v48_v36 = vld [vmem:[#allocation2 + $0x48] sm:$0xff] }
  0xee   :  { %2818 = vmatprep.subr.bf16.mxu0 %v3748_v37  ;;  %v60_v37 = vld [vmem:[#allocation2 + $0xa8] sm:$0xff] }
  0xef   :  { %v3911_v30 = vld [vmem:[#allocation5 + $0x4e0] ss:$8 sps:$4 sm:$0xff]  }
  0xf0   :  { %2573 = vmatpush1.bf16.msra.mxu1 %v3743_v38  ;;  %v3835_v38 = vld [vmem:[#allocation5 + $0x414] ss:$8 sps:$4 sm:$0xff]  }
  0xf1   :  { %2819 = vmatpush1.bf16.msra.mxu0 %v3746_v39  ;;  %2574 = vmatprep.subr.bf16.mxu1 %v3751_v40  ;;  %v3838_v39 = vld [vmem:[#allocation5 + $0xa14] ss:$8 sps:$4 sm:$0xff]   ;;  %v73_v40 = vpack.c.bf16 %v48_v36, %v48_v36 }
  0xf2   :  { %2820 = vmatprep.subr.bf16.mxu0 %v3754_v41  ;;  %v85_v41 = vpack.c.bf16 %v60_v37, %v60_v37  ;;  %v47_v36 = vld [vmem:[#allocation2 + $0x40] sm:$0xff] }
  0xf3   :  { %v59_v37 = vld [vmem:[#allocation2 + $0xa0] sm:$0xff] }
  0xf4   :  { %2575 = vmatpush1.bf16.msra.mxu1 %v3749_v42  ;;  %v3833_v42 = vld [vmem:[#allocation5 + $0x410] ss:$8 sps:$4 sm:$0xff]  }
  0xf5   :  { %2821 = vmatpush1.bf16.msra.mxu0 %v3752_v43  ;;  %2576 = vmatprep.subr.bf16.mxu1 %v3757_v44  ;;  %v3836_v43 = vld [vmem:[#allocation5 + $0xa10] ss:$8 sps:$4 sm:$0xff]   ;;  %v3841_v44 = vld [vmem:[#allocation5 + $0x424] ss:$8 sps:$4 sm:$0xff]  }
  0xf6   :  { %2822 = vmatprep.subr.bf16.mxu0 %v3760_v45  ;;  %v3844_v45 = vld [vmem:[#allocation5 + $0xa24] ss:$8 sps:$4 sm:$0xff]  }
  0xf8   :  { %2577 = vmatpush1.bf16.msra.mxu1 %v3755_v46  ;;  %v3839_v46 = vld [vmem:[#allocation5 + $0x420] ss:$8 sps:$4 sm:$0xff]  }
  0xf9   :  { %2823 = vmatpush1.bf16.msra.mxu0 %v3758_v47  ;;  %2578 = vmatprep.subr.bf16.mxu1 %v3763_v48  ;;  %v3842_v47 = vld [vmem:[#allocation5 + $0xa20] ss:$8 sps:$4 sm:$0xff]   ;;  %v3847_v48 = vld [vmem:[#allocation5 + $0x434] ss:$8 sps:$4 sm:$0xff]  }
  0xfa   :  { %2824 = vmatprep.subr.bf16.mxu0 %v3766_v49  ;;  %v3850_v49 = vld [vmem:[#allocation5 + $0xa34] ss:$8 sps:$4 sm:$0xff]  }
  0xfc   :  { %2579 = vmatpush1.bf16.msra.mxu1 %v3761_v50  ;;  %v3845_v50 = vld [vmem:[#allocation5 + $0x430] ss:$8 sps:$4 sm:$0xff]  }
  0xfd   :  { %2825 = vmatpush1.bf16.msra.mxu0 %v3764_v51  ;;  %2580 = vmatprep.subr.bf16.mxu1 %v3769_v52  ;;  %v3848_v51 = vld [vmem:[#allocation5 + $0xa30] ss:$8 sps:$4 sm:$0xff]   ;;  %v3853_v52 = vld [vmem:[#allocation5 + $0x444] ss:$8 sps:$4 sm:$0xff]  }
  0xfe   :  { %2826 = vmatprep.subr.bf16.mxu0 %v3772_v53  ;;  %v3856_v53 = vld [vmem:[#allocation5 + $0xa44] ss:$8 sps:$4 sm:$0xff]  }
 0x100   :  { %2581 = vmatpush1.bf16.msra.mxu1 %v3767_v54  ;;  %v3851_v54 = vld [vmem:[#allocation5 + $0x440] ss:$8 sps:$4 sm:$0xff]  }
 0x101   :  { %2827 = vmatpush1.bf16.msra.mxu0 %v3770_v55  ;;  %2582 = vmatprep.subr.bf16.mxu1 %v3775_v56  ;;  %v3854_v55 = vld [vmem:[#allocation5 + $0xa40] ss:$8 sps:$4 sm:$0xff]   ;;  %v3859_v56 = vld [vmem:[#allocation5 + $0x454] ss:$8 sps:$4 sm:$0xff]  }
 0x102   :  { %2828 = vmatprep.subr.bf16.mxu0 %v3778_v57  ;;  %v3862_v57 = vld [vmem:[#allocation5 + $0xa54] ss:$8 sps:$4 sm:$0xff]  }
 0x104   :  { %2583 = vmatpush1.bf16.msra.mxu1 %v3773_v58  ;;  %v3857_v58 = vld [vmem:[#allocation5 + $0x450] ss:$8 sps:$4 sm:$0xff]  }
 0x105   :  { %2829 = vmatpush1.bf16.msra.mxu0 %v3776_v59  ;;  %2584 = vmatprep.subr.bf16.mxu1 %v3781_v60  ;;  %v3860_v59 = vld [vmem:[#allocation5 + $0xa50] ss:$8 sps:$4 sm:$0xff]   ;;  %v3865_v60 = vld [vmem:[#allocation5 + $0x464] ss:$8 sps:$4 sm:$0xff]  }
 0x106   :  { %2830 = vmatprep.subr.bf16.mxu0 %v3784_v61  ;;  %v3868_v61 = vld [vmem:[#allocation5 + $0xa64] ss:$8 sps:$4 sm:$0xff]  }
 0x108   :  { %2585 = vmatpush1.bf16.msra.mxu1 %v3779_v62  ;;  %v3863_v62 = vld [vmem:[#allocation5 + $0x460] ss:$8 sps:$4 sm:$0xff]  }
 0x109   :  { %2831 = vmatpush1.bf16.msra.mxu0 %v3782_v63  ;;  %2586 = vmatprep.subr.bf16.mxu1 %v3787_v0  ;;  %v3866_v63 = vld [vmem:[#allocation5 + $0xa60] ss:$8 sps:$4 sm:$0xff]   ;;  %v3871_v0 = vld [vmem:[#allocation5 + $0x474] ss:$8 sps:$4 sm:$0xff]  }
 0x10a   :  { %2832 = vmatprep.subr.bf16.mxu0 %v3790_v1  ;;  %v3874_v1 = vld [vmem:[#allocation5 + $0xa74] ss:$8 sps:$4 sm:$0xff]  }
 0x10c   :  { %2587 = vmatpush1.bf16.msra.mxu1 %v3785_v2  ;;  %v3869_v2 = vld [vmem:[#allocation5 + $0x470] ss:$8 sps:$4 sm:$0xff]  }
 0x10d   :  { %2833 = vmatpush1.bf16.msra.mxu0 %v3788_v3  ;;  %2588 = vmatprep.subr.bf16.mxu1 %v3793_v4  ;;  %v3872_v3 = vld [vmem:[#allocation5 + $0xa70] ss:$8 sps:$4 sm:$0xff]   ;;  %v3877_v4 = vld [vmem:[#allocation5 + $0x484] ss:$8 sps:$4 sm:$0xff]  }
 0x10e   :  { %2834 = vmatprep.subr.bf16.mxu0 %v3796_v5  ;;  %v3880_v5 = vld [vmem:[#allocation5 + $0xa84] ss:$8 sps:$4 sm:$0xff]  }
 0x110   :  { %2589 = vmatpush1.bf16.msra.mxu1 %v3791_v6  ;;  %v3875_v6 = vld [vmem:[#allocation5 + $0x480] ss:$8 sps:$4 sm:$0xff]  }
 0x111   :  { %2835 = vmatpush1.bf16.msra.mxu0 %v3794_v7  ;;  %2590 = vmatprep.subr.bf16.mxu1 %v3799_v8  ;;  %v3878_v7 = vld [vmem:[#allocation5 + $0xa80] ss:$8 sps:$4 sm:$0xff]   ;;  %v3883_v8 = vld [vmem:[#allocation5 + $0x494] ss:$8 sps:$4 sm:$0xff]  }
 0x112   :  { %2836 = vmatprep.subr.bf16.mxu0 %v3802_v9  ;;  %v3886_v9 = vld [vmem:[#allocation5 + $0xa94] ss:$8 sps:$4 sm:$0xff]  }
 0x114   :  { %2591 = vmatpush1.bf16.msra.mxu1 %v3797_v10  ;;  %v3881_v10 = vld [vmem:[#allocation5 + $0x490] ss:$8 sps:$4 sm:$0xff]  }
 0x115   :  { %2837 = vmatpush1.bf16.msra.mxu0 %v3800_v11  ;;  %2592 = vmatprep.subr.bf16.mxu1 %v3805_v12  ;;  %v3884_v11 = vld [vmem:[#allocation5 + $0xa90] ss:$8 sps:$4 sm:$0xff]   ;;  %v3889_v12 = vld [vmem:[#allocation5 + $0x4a4] ss:$8 sps:$4 sm:$0xff]  }
 0x116   :  { %2838 = vmatprep.subr.bf16.mxu0 %v3808_v13  ;;  %v3892_v13 = vld [vmem:[#allocation5 + $0xaa4] ss:$8 sps:$4 sm:$0xff]  }
 0x118   :  { %2593 = vmatpush1.bf16.msra.mxu1 %v3803_v14  ;;  %v3887_v14 = vld [vmem:[#allocation5 + $0x4a0] ss:$8 sps:$4 sm:$0xff]  }
 0x119   :  { %2839 = vmatpush1.bf16.msra.mxu0 %v3806_v15  ;;  %2594 = vmatprep.subr.bf16.mxu1 %v3811_v16  ;;  %v3890_v15 = vld [vmem:[#allocation5 + $0xaa0] ss:$8 sps:$4 sm:$0xff]   ;;  %v3895_v16 = vld [vmem:[#allocation5 + $0x4b4] ss:$8 sps:$4 sm:$0xff]  }
 0x11a   :  { %2840 = vmatprep.subr.bf16.mxu0 %v3814_v17  ;;  %v3898_v17 = vld [vmem:[#allocation5 + $0xab4] ss:$8 sps:$4 sm:$0xff]  }
 0x11c   :  { %2595 = vmatpush1.bf16.msra.mxu1 %v3809_v18  ;;  %v3893_v18 = vld [vmem:[#allocation5 + $0x4b0] ss:$8 sps:$4 sm:$0xff]  }
 0x11d   :  { %2841 = vmatpush1.bf16.msra.mxu0 %v3812_v19  ;;  %2596 = vmatprep.subr.bf16.mxu1 %v3817_v20  ;;  %v3896_v19 = vld [vmem:[#allocation5 + $0xab0] ss:$8 sps:$4 sm:$0xff]   ;;  %v3901_v20 = vld [vmem:[#allocation5 + $0x4c4] ss:$8 sps:$4 sm:$0xff]  }
 0x11e   :  { %2842 = vmatprep.subr.bf16.mxu0 %v3820_v21  ;;  %v3904_v21 = vld [vmem:[#allocation5 + $0xac4] ss:$8 sps:$4 sm:$0xff]  }
 0x120   :  { %2597 = vmatpush1.bf16.msra.mxu1 %v3815_v22  ;;  %v3899_v22 = vld [vmem:[#allocation5 + $0x4c0] ss:$8 sps:$4 sm:$0xff]  }
 0x121   :  { %2843 = vmatpush1.bf16.msra.mxu0 %v3818_v23  ;;  %2598 = vmatprep.subr.bf16.mxu1 %v3823_v24  ;;  %v3902_v23 = vld [vmem:[#allocation5 + $0xac0] ss:$8 sps:$4 sm:$0xff]   ;;  %v3907_v24 = vld [vmem:[#allocation5 + $0x4d4] ss:$8 sps:$4 sm:$0xff]  }
 0x122   :  { %2844 = vmatprep.subr.bf16.mxu0 %v3826_v25  ;;  %v3910_v25 = vld [vmem:[#allocation5 + $0xad4] ss:$8 sps:$4 sm:$0xff]  }
 0x124   :  { %2599 = vmatpush1.bf16.msra.mxu1 %v3821_v26  ;;  %v3905_v26 = vld [vmem:[#allocation5 + $0x4d0] ss:$8 sps:$4 sm:$0xff]  }
 0x125   :  { %2845 = vmatpush1.bf16.msra.mxu0 %v3824_v27  ;;  %2609 = vmatprep.subr.bf16.mxu1 %v3829_v28  ;;  %v3908_v27 = vld [vmem:[#allocation5 + $0xad0] ss:$8 sps:$4 sm:$0xff]   ;;  %v3913_v28 = vld [vmem:[#allocation5 + $0x4e4] ss:$8 sps:$4 sm:$0xff]  }
 0x126   :  { %2855 = vmatprep.subr.bf16.mxu0 %v3832_v31  ;;  %v3914_v31 = vld [vmem:[#allocation5 + $0xae0] ss:$8 sps:$4 sm:$0xff]  }
 0x127   :  { %2601 = vmatmul.mubr.bf16.vlgmr.msra.gmra.mrb[0].mxu1 %v70_v34  ;;  %v3917_v34 = vld [vmem:[#allocation5 + $0x4f0] ss:$8 sps:$4 sm:$0xff]  }
 0x128   :  { %2847 = vmatmul.mubr.bf16.vlgmr.msra.gmra.mrb[0].mxu0 %v82_v35  ;;  %2610 = vmatpush1.bf16.msra.mxu1 %v3827_v32  ;;  %v3919_v32 = vld [vmem:[#allocation5 + $0x4f4] ss:$8 sps:$4 sm:$0xff]   ;;  %v3920_v35 = vld [vmem:[#allocation5 + $0xaf0] ss:$8 sps:$4 sm:$0xff]  }
 0x129   :  { %2856 = vmatpush1.bf16.msra.mxu0 %v3830_v33  ;;  %2611 = vmatprep.subr.bf16.mxu1 %v3835_v38  ;;  %v3922_v33 = vld [vmem:[#allocation5 + $0xaf4] ss:$8 sps:$4 sm:$0xff]   ;;  %v3925_v38 = vld [vmem:[#allocation5 + $0x504] ss:$8 sps:$4 sm:$0xff]  }
 0x12a   :  { %2857 = vmatprep.subr.bf16.mxu0 %v3838_v39  ;;  %2641 = vmatprep.mubr.bf16.mxu1 %v73_v40  ;;  %v3928_v39 = vld [vmem:[#allocation5 + $0xb04] ss:$8 sps:$4 sm:$0xff]   ;;  %v72_v40 = vpack.c.bf16 %v47_v36, %v47_v36 }
 0x12b   :  { %2887 = vmatprep.mubr.bf16.mxu0 %v85_v41  ;;  %v84_v41 = vpack.c.bf16 %v59_v37, %v59_v37  ;;  %v4009_v36 = vld [vmem:[#allocation5 + $0x5e4] ss:$8 sps:$4 sm:$0xff]  }
 0x12c   :  { %2612 = vmatpush1.bf16.msra.mxu1 %v3833_v42  ;;  %v50_v42 = vld [vmem:[#allocation2 + $0x58] sm:$0xff]  ;;  %v4012_v37 = vld [vmem:[#allocation5 + $0xbe4] ss:$8 sps:$4 sm:$0xff]  }
 0x12d   :  { %2858 = vmatpush1.bf16.msra.mxu0 %v3836_v43  ;;  %2613 = vmatprep.subr.bf16.mxu1 %v3841_v44  ;;  %v62_v43 = vld [vmem:[#allocation2 + $0xb8] sm:$0xff]  ;;  %v3923_v44 = vld [vmem:[#allocation5 + $0x500] ss:$8 sps:$4 sm:$0xff]  }
 0x12e   :  { %2859 = vmatprep.subr.bf16.mxu0 %v3844_v45  ;;  %v3926_v45 = vld [vmem:[#allocation5 + $0xb00] ss:$8 sps:$4 sm:$0xff]  }
 0x130   :  { %2614 = vmatpush1.bf16.msra.mxu1 %v3839_v46  ;;  %v3931_v46 = vld [vmem:[#allocation5 + $0x514] ss:$8 sps:$4 sm:$0xff]  }
 0x131   :  { %2860 = vmatpush1.bf16.msra.mxu0 %v3842_v47  ;;  %2615 = vmatprep.subr.bf16.mxu1 %v3847_v48  ;;  %v3934_v47 = vld [vmem:[#allocation5 + $0xb14] ss:$8 sps:$4 sm:$0xff]   ;;  %v75_v48 = vpack.c.bf16 %v50_v42, %v50_v42  ;;  %v4013_v42 = vld [vmem:[#allocation5 + $0x5f0] ss:$8 sps:$4 sm:$0xff]  }
 0x132   :  { %2861 = vmatprep.subr.bf16.mxu0 %v3850_v49  ;;  %v87_v49 = vpack.c.bf16 %v62_v43, %v62_v43  ;;  %v4016_v43 = vld [vmem:[#allocation5 + $0xbf0] ss:$8 sps:$4 sm:$0xff]  }
 0x134   :  { %2616 = vmatpush1.bf16.msra.mxu1 %v3845_v50  ;;  %v3929_v50 = vld [vmem:[#allocation5 + $0x510] ss:$8 sps:$4 sm:$0xff]  }
 0x135   :  { %2862 = vmatpush1.bf16.msra.mxu0 %v3848_v51  ;;  %2617 = vmatprep.subr.bf16.mxu1 %v3853_v52  ;;  %v3932_v51 = vld [vmem:[#allocation5 + $0xb10] ss:$8 sps:$4 sm:$0xff]   ;;  %v3937_v52 = vld [vmem:[#allocation5 + $0x524] ss:$8 sps:$4 sm:$0xff]  }
 0x136   :  { %2863 = vmatprep.subr.bf16.mxu0 %v3856_v53  ;;  %v3940_v53 = vld [vmem:[#allocation5 + $0xb24] ss:$8 sps:$4 sm:$0xff]  }
 0x138   :  { %2618 = vmatpush1.bf16.msra.mxu1 %v3851_v54  ;;  %v3935_v54 = vld [vmem:[#allocation5 + $0x520] ss:$8 sps:$4 sm:$0xff]  }
 0x139   :  { %2864 = vmatpush1.bf16.msra.mxu0 %v3854_v55  ;;  %2619 = vmatprep.subr.bf16.mxu1 %v3859_v56  ;;  %v3938_v55 = vld [vmem:[#allocation5 + $0xb20] ss:$8 sps:$4 sm:$0xff]   ;;  %v3943_v56 = vld [vmem:[#allocation5 + $0x534] ss:$8 sps:$4 sm:$0xff]  }
 0x13a   :  { %2865 = vmatprep.subr.bf16.mxu0 %v3862_v57  ;;  %v3946_v57 = vld [vmem:[#allocation5 + $0xb34] ss:$8 sps:$4 sm:$0xff]  }
 0x13c   :  { %2620 = vmatpush1.bf16.msra.mxu1 %v3857_v58  ;;  %v3941_v58 = vld [vmem:[#allocation5 + $0x530] ss:$8 sps:$4 sm:$0xff]  }
 0x13d   :  { %2866 = vmatpush1.bf16.msra.mxu0 %v3860_v59  ;;  %2621 = vmatprep.subr.bf16.mxu1 %v3865_v60  ;;  %v3944_v59 = vld [vmem:[#allocation5 + $0xb30] ss:$8 sps:$4 sm:$0xff]   ;;  %v3949_v60 = vld [vmem:[#allocation5 + $0x544] ss:$8 sps:$4 sm:$0xff]  }
 0x13e   :  { %2867 = vmatprep.subr.bf16.mxu0 %v3868_v61  ;;  %v3952_v61 = vld [vmem:[#allocation5 + $0xb44] ss:$8 sps:$4 sm:$0xff]  }
 0x140   :  { %2622 = vmatpush1.bf16.msra.mxu1 %v3863_v62  ;;  %v3947_v62 = vld [vmem:[#allocation5 + $0x540] ss:$8 sps:$4 sm:$0xff]  }
 0x141   :  { %2868 = vmatpush1.bf16.msra.mxu0 %v3866_v63  ;;  %2623 = vmatprep.subr.bf16.mxu1 %v3871_v0  ;;  %v3950_v63 = vld [vmem:[#allocation5 + $0xb40] ss:$8 sps:$4 sm:$0xff]   ;;  %v3955_v0 = vld [vmem:[#allocation5 + $0x554] ss:$8 sps:$4 sm:$0xff]  }
 0x142   :  { %2869 = vmatprep.subr.bf16.mxu0 %v3874_v1  ;;  %v3958_v1 = vld [vmem:[#allocation5 + $0xb54] ss:$8 sps:$4 sm:$0xff]  }
 0x144   :  { %2624 = vmatpush1.bf16.msra.mxu1 %v3869_v2  ;;  %v3953_v2 = vld [vmem:[#allocation5 + $0x550] ss:$8 sps:$4 sm:$0xff]  }
 0x145   :  { %2870 = vmatpush1.bf16.msra.mxu0 %v3872_v3  ;;  %2625 = vmatprep.subr.bf16.mxu1 %v3877_v4  ;;  %v3956_v3 = vld [vmem:[#allocation5 + $0xb50] ss:$8 sps:$4 sm:$0xff]   ;;  %v3961_v4 = vld [vmem:[#allocation5 + $0x564] ss:$8 sps:$4 sm:$0xff]  }
 0x146   :  { %2871 = vmatprep.subr.bf16.mxu0 %v3880_v5  ;;  %v3964_v5 = vld [vmem:[#allocation5 + $0xb64] ss:$8 sps:$4 sm:$0xff]  }
 0x148   :  { %2626 = vmatpush1.bf16.msra.mxu1 %v3875_v6  ;;  %v3959_v6 = vld [vmem:[#allocation5 + $0x560] ss:$8 sps:$4 sm:$0xff]  }
 0x149   :  { %2872 = vmatpush1.bf16.msra.mxu0 %v3878_v7  ;;  %2627 = vmatprep.subr.bf16.mxu1 %v3883_v8  ;;  %v3962_v7 = vld [vmem:[#allocation5 + $0xb60] ss:$8 sps:$4 sm:$0xff]   ;;  %v3967_v8 = vld [vmem:[#allocation5 + $0x574] ss:$8 sps:$4 sm:$0xff]  }
 0x14a   :  { %2873 = vmatprep.subr.bf16.mxu0 %v3886_v9  ;;  %v3970_v9 = vld [vmem:[#allocation5 + $0xb74] ss:$8 sps:$4 sm:$0xff]  }
 0x14c   :  { %2628 = vmatpush1.bf16.msra.mxu1 %v3881_v10  ;;  %v3965_v10 = vld [vmem:[#allocation5 + $0x570] ss:$8 sps:$4 sm:$0xff]  }
 0x14d   :  { %2874 = vmatpush1.bf16.msra.mxu0 %v3884_v11  ;;  %2629 = vmatprep.subr.bf16.mxu1 %v3889_v12  ;;  %v3968_v11 = vld [vmem:[#allocation5 + $0xb70] ss:$8 sps:$4 sm:$0xff]   ;;  %v3973_v12 = vld [vmem:[#allocation5 + $0x584] ss:$8 sps:$4 sm:$0xff]  }
 0x14e   :  { %2875 = vmatprep.subr.bf16.mxu0 %v3892_v13  ;;  %v3976_v13 = vld [vmem:[#allocation5 + $0xb84] ss:$8 sps:$4 sm:$0xff]  }
 0x150   :  { %2630 = vmatpush1.bf16.msra.mxu1 %v3887_v14  ;;  %v3971_v14 = vld [vmem:[#allocation5 + $0x580] ss:$8 sps:$4 sm:$0xff]  }
 0x151   :  { %2876 = vmatpush1.bf16.msra.mxu0 %v3890_v15  ;;  %2631 = vmatprep.subr.bf16.mxu1 %v3895_v16  ;;  %v3974_v15 = vld [vmem:[#allocation5 + $0xb80] ss:$8 sps:$4 sm:$0xff]   ;;  %v3979_v16 = vld [vmem:[#allocation5 + $0x594] ss:$8 sps:$4 sm:$0xff]  }
 0x152   :  { %2877 = vmatprep.subr.bf16.mxu0 %v3898_v17  ;;  %v3982_v17 = vld [vmem:[#allocation5 + $0xb94] ss:$8 sps:$4 sm:$0xff]  }
 0x154   :  { %2632 = vmatpush1.bf16.msra.mxu1 %v3893_v18  ;;  %v3977_v18 = vld [vmem:[#allocation5 + $0x590] ss:$8 sps:$4 sm:$0xff]  }
 0x155   :  { %2878 = vmatpush1.bf16.msra.mxu0 %v3896_v19  ;;  %2633 = vmatprep.subr.bf16.mxu1 %v3901_v20  ;;  %v3980_v19 = vld [vmem:[#allocation5 + $0xb90] ss:$8 sps:$4 sm:$0xff]   ;;  %v3985_v20 = vld [vmem:[#allocation5 + $0x5a4] ss:$8 sps:$4 sm:$0xff]  }
 0x156   :  { %2879 = vmatprep.subr.bf16.mxu0 %v3904_v21  ;;  %v3988_v21 = vld [vmem:[#allocation5 + $0xba4] ss:$8 sps:$4 sm:$0xff]  }
 0x158   :  { %2634 = vmatpush1.bf16.msra.mxu1 %v3899_v22  ;;  %v3983_v22 = vld [vmem:[#allocation5 + $0x5a0] ss:$8 sps:$4 sm:$0xff]  }
 0x159   :  { %2880 = vmatpush1.bf16.msra.mxu0 %v3902_v23  ;;  %2635 = vmatprep.subr.bf16.mxu1 %v3907_v24  ;;  %v3986_v23 = vld [vmem:[#allocation5 + $0xba0] ss:$8 sps:$4 sm:$0xff]   ;;  %v3991_v24 = vld [vmem:[#allocation5 + $0x5b4] ss:$8 sps:$4 sm:$0xff]  }
 0x15a   :  { %2881 = vmatprep.subr.bf16.mxu0 %v3910_v25  ;;  %v3994_v25 = vld [vmem:[#allocation5 + $0xbb4] ss:$8 sps:$4 sm:$0xff]  }
 0x15c   :  { %2636 = vmatpush1.bf16.msra.mxu1 %v3905_v26  ;;  %v3989_v26 = vld [vmem:[#allocation5 + $0x5b0] ss:$8 sps:$4 sm:$0xff]  }
 0x15d   :  { %2882 = vmatpush1.bf16.msra.mxu0 %v3908_v27  ;;  %2637 = vmatprep.subr.bf16.mxu1 %v3913_v28  ;;  %v3992_v27 = vld [vmem:[#allocation5 + $0xbb0] ss:$8 sps:$4 sm:$0xff]   ;;  %v3997_v28 = vld [vmem:[#allocation5 + $0x5c4] ss:$8 sps:$4 sm:$0xff]  }
 0x15e   :  { %2883 = vmatprep.subr.bf16.mxu0 %v3916_v29  ;;  %v4000_v29 = vld [vmem:[#allocation5 + $0xbc4] ss:$8 sps:$4 sm:$0xff]  }
 0x160   :  { %2638 = vmatpush1.bf16.msra.mxu1 %v3911_v30  ;;  %v3995_v30 = vld [vmem:[#allocation5 + $0x5c0] ss:$8 sps:$4 sm:$0xff]  }
 0x161   :  { %2884 = vmatpush1.bf16.msra.mxu0 %v3914_v31  ;;  %2639 = vmatprep.subr.bf16.mxu1 %v3919_v32  ;;  %v3998_v31 = vld [vmem:[#allocation5 + $0xbc0] ss:$8 sps:$4 sm:$0xff]   ;;  %v4003_v32 = vld [vmem:[#allocation5 + $0x5d4] ss:$8 sps:$4 sm:$0xff]  }
 0x162   :  { %2885 = vmatprep.subr.bf16.mxu0 %v3922_v33  ;;  %v4006_v33 = vld [vmem:[#allocation5 + $0xbd4] ss:$8 sps:$4 sm:$0xff]  }
 0x164   :  { %2640 = vmatpush1.bf16.msra.mxu1 %v3917_v34  ;;  %v4001_v34 = vld [vmem:[#allocation5 + $0x5d0] ss:$8 sps:$4 sm:$0xff]  }
 0x165   :  { %2886 = vmatpush1.bf16.msra.mxu0 %v3920_v35  ;;  %2650 = vmatprep.subr.bf16.mxu1 %v3925_v38  ;;  %v4004_v35 = vld [vmem:[#allocation5 + $0xbd0] ss:$8 sps:$4 sm:$0xff]   ;;  %v4007_v38 = vld [vmem:[#allocation5 + $0x5e0] ss:$8 sps:$4 sm:$0xff]  }
 0x166   :  { %2896 = vmatprep.subr.bf16.mxu0 %v3928_v39  ;;  %v4010_v39 = vld [vmem:[#allocation5 + $0xbe0] ss:$8 sps:$4 sm:$0xff]  }
 0x167   :  { %2642 = vmatmul.mubr.bf16.vlgmr.msra.gmra.mrb[0].mxu1 %v72_v40  ;;  %v4015_v40 = vld [vmem:[#allocation5 + $0x5f4] ss:$8 sps:$4 sm:$0xff]  }
 0x168   :  { %2888 = vmatmul.mubr.bf16.vlgmr.msra.gmra.mrb[0].mxu0 %v84_v41  ;;  %2651 = vmatpush1.bf16.msra.mxu1 %v3923_v44  ;;  %v4018_v41 = vld [vmem:[#allocation5 + $0xbf4] ss:$8 sps:$4 sm:$0xff]   ;;  %v49_v44 = vld [vmem:[#allocation2 + $0x50] sm:$0xff] }
 0x169   :  { %2897 = vmatpush1.bf16.msra.mxu0 %v3926_v45  ;;  %2652 = vmatprep.subr.bf16.mxu1 %v3931_v46  ;;  %v61_v45 = vld [vmem:[#allocation2 + $0xb0] sm:$0xff] }
 0x16a   :  { %2898 = vmatprep.subr.bf16.mxu0 %v3934_v47  ;;  %2682 = vmatprep.mubr.bf16.mxu1 %v75_v48  ;;  %v4021_v46 = vld [vmem:[#allocation5 + $0xc04] ss:$8 sps:$4 sm:$0xff]   ;;  %v74_v47 = vpack.c.bf16 %v49_v44, %v49_v44  ;;  %v86_v48 = vpack.c.bf16 %v61_v45, %v61_v45 }
 0x16b   :  { %2928 = vmatprep.mubr.bf16.mxu0 %v87_v49  ;;  %v4019_v49 = vld [vmem:[#allocation5 + $0xc00] ss:$8 sps:$4 sm:$0xff]  }
 0x16c   :  { %2653 = vmatpush1.bf16.msra.mxu1 %v3929_v50  ;;  %v4024_v50 = vld [vmem:[#allocation5 + $0xc14] ss:$8 sps:$4 sm:$0xff]  }
 0x16d   :  { %2899 = vmatpush1.bf16.msra.mxu0 %v3932_v51  ;;  %2654 = vmatprep.subr.bf16.mxu1 %v3937_v52  ;;  %v4022_v51 = vld [vmem:[#allocation5 + $0xc10] ss:$8 sps:$4 sm:$0xff]   ;;  %v4107_v52 = vmov 0  }
 0x16e   :  { %2900 = vmatprep.subr.bf16.mxu0 %v3940_v53  ;;  %v4027_v53 = vld [vmem:[#allocation5 + $0xc24] ss:$8 sps:$4 sm:$0xff]  }
 0x170   :  { %2655 = vmatpush1.bf16.msra.mxu1 %v3935_v54  ;;  %v4025_v54 = vld [vmem:[#allocation5 + $0xc20] ss:$8 sps:$4 sm:$0xff]  }
 0x171   :  { %2901 = vmatpush1.bf16.msra.mxu0 %v3938_v55  ;;  %2656 = vmatprep.subr.bf16.mxu1 %v3943_v56  ;;  %v4030_v55 = vld [vmem:[#allocation5 + $0xc34] ss:$8 sps:$4 sm:$0xff]   ;;  %v4028_v56 = vld [vmem:[#allocation5 + $0xc30] ss:$8 sps:$4 sm:$0xff]  }
 0x172   :  { %2902 = vmatprep.subr.bf16.mxu0 %v3946_v57  ;;  %v63_v57 = vld [vmem:[#allocation2 + $0xc0] sm:$0xff] }
 0x174   :  { %2657 = vmatpush1.bf16.msra.mxu1 %v3941_v58  ;;  %v88_v58 = vpack.c.bf16 %v63_v57, %v63_v57 }
 0x175   :  { %2903 = vmatpush1.bf16.msra.mxu0 %v3944_v59  ;;  %2658 = vmatprep.subr.bf16.mxu1 %v3949_v60 }
 0x176   :  { %2904 = vmatprep.subr.bf16.mxu0 %v3952_v61 }
 0x178   :  { %2659 = vmatpush1.bf16.msra.mxu1 %v3947_v62 }
 0x179   :  { %2905 = vmatpush1.bf16.msra.mxu0 %v3950_v63  ;;  %2660 = vmatprep.subr.bf16.mxu1 %v3955_v0 }
 0x17a   :  { %2906 = vmatprep.subr.bf16.mxu0 %v3958_v1 }
 0x17c   :  { %2661 = vmatpush1.bf16.msra.mxu1 %v3953_v2 }
 0x17d   :  { %2907 = vmatpush1.bf16.msra.mxu0 %v3956_v3  ;;  %2662 = vmatprep.subr.bf16.mxu1 %v3961_v4 }
 0x17e   :  { %2908 = vmatprep.subr.bf16.mxu0 %v3964_v5 }
 0x180   :  { %2663 = vmatpush1.bf16.msra.mxu1 %v3959_v6 }
 0x181   :  { %2909 = vmatpush1.bf16.msra.mxu0 %v3962_v7  ;;  %2664 = vmatprep.subr.bf16.mxu1 %v3967_v8 }
 0x182   :  { %2910 = vmatprep.subr.bf16.mxu0 %v3970_v9 }
 0x184   :  { %2665 = vmatpush1.bf16.msra.mxu1 %v3965_v10 }
 0x185   :  { %2911 = vmatpush1.bf16.msra.mxu0 %v3968_v11  ;;  %2666 = vmatprep.subr.bf16.mxu1 %v3973_v12 }
 0x186   :  { %2912 = vmatprep.subr.bf16.mxu0 %v3976_v13 }
 0x188   :  { %2667 = vmatpush1.bf16.msra.mxu1 %v3971_v14 }
 0x189   :  { %2913 = vmatpush1.bf16.msra.mxu0 %v3974_v15  ;;  %2668 = vmatprep.subr.bf16.mxu1 %v3979_v16 }
 0x18a   :  { %2914 = vmatprep.subr.bf16.mxu0 %v3982_v17 }
 0x18c   :  { %2669 = vmatpush1.bf16.msra.mxu1 %v3977_v18 }
 0x18d   :  { %2915 = vmatpush1.bf16.msra.mxu0 %v3980_v19  ;;  %2670 = vmatprep.subr.bf16.mxu1 %v3985_v20 }
 0x18e   :  { %2916 = vmatprep.subr.bf16.mxu0 %v3988_v21 }
 0x190   :  { %2671 = vmatpush1.bf16.msra.mxu1 %v3983_v22 }
 0x191   :  { %2917 = vmatpush1.bf16.msra.mxu0 %v3986_v23  ;;  %2672 = vmatprep.subr.bf16.mxu1 %v3991_v24 }
 0x192   :  { %2918 = vmatprep.subr.bf16.mxu0 %v3994_v25 }
 0x194   :  { %2673 = vmatpush1.bf16.msra.mxu1 %v3989_v26 }
 0x195   :  { %2919 = vmatpush1.bf16.msra.mxu0 %v3992_v27  ;;  %2674 = vmatprep.subr.bf16.mxu1 %v3997_v28 }
 0x196   :  { %2920 = vmatprep.subr.bf16.mxu0 %v4000_v29 }
 0x198   :  { %2675 = vmatpush1.bf16.msra.mxu1 %v3995_v30 }
 0x199   :  { %2921 = vmatpush1.bf16.msra.mxu0 %v3998_v31  ;;  %2676 = vmatprep.subr.bf16.mxu1 %v4003_v32 }
 0x19a   :  { %2922 = vmatprep.subr.bf16.mxu0 %v4006_v33 }
 0x19c   :  { %2677 = vmatpush1.bf16.msra.mxu1 %v4001_v34 }
 0x19d   :  { %2923 = vmatpush1.bf16.msra.mxu0 %v4004_v35  ;;  %2678 = vmatprep.subr.bf16.mxu1 %v4009_v36 }
 0x19e   :  { %2924 = vmatprep.subr.bf16.mxu0 %v4012_v37 }
 0x1a0   :  { %2679 = vmatpush1.bf16.msra.mxu1 %v4007_v38 }
 0x1a1   :  { %2925 = vmatpush1.bf16.msra.mxu0 %v4010_v39  ;;  %2680 = vmatprep.subr.bf16.mxu1 %v4015_v40 }
 0x1a2   :  { %2926 = vmatprep.subr.bf16.mxu0 %v4018_v41 }
 0x1a4   :  { %2681 = vmatpush1.bf16.msra.mxu1 %v4013_v42 }
 0x1a5   :  { %2927 = vmatpush1.bf16.msra.mxu0 %v4016_v43 }
 0x1a6   :  { %2937 = vmatprep.subr.bf16.mxu0 %v4021_v46 }
 0x1a7   :  { %2683 = vmatmul.mubr.bf16.vlgmr.msra.gmra.mrb[0].mxu1 %v74_v47 }
 0x1a8   :  { %2929 = vmatmul.mubr.bf16.vlgmr.msra.gmra.mrb[0].mxu0 %v86_v48 }
 0x1a9   :  { %2938 = vmatpush1.bf16.msra.mxu0 %v4019_v49  ;;  %2969 = vmatprep.mubr.bf16.mxu0 %v4107_v52 }
 0x1aa   :  { %2939 = vmatprep.subr.bf16.mxu0 %v4024_v50 }
 0x1ad   :  { %2940 = vmatpush1.bf16.msra.mxu0 %v4022_v51 }
 0x1ae   :  { %2941 = vmatprep.subr.bf16.mxu0 %v4027_v53 }
 0x1b1   :  { %2942 = vmatpush1.bf16.msra.mxu0 %v4025_v54 }
 0x1b2   :  { %2943 = vmatprep.subr.bf16.mxu0 %v4030_v55 }
 0x1b5   :  { %2944 = vmatpush1.bf16.msra.mxu0 %v4028_v56 }
 0x1b8   :  { %3390 = vmatmul.mubr.msk.bf16.vlgmr.msra.gmra.mrb[0].mxu0 %vm2441_vm0, %v88_v58 }
 0x27a   :  { %v2684_v59 = vpop.f32.mrb[0].mxu1 }
 0x27b   :  { %v2686_v60 = vpop.f32.mrb[1].mxu1 }
 0x27c   :  { %v2688_v61 = vpop.f32.mrb[2].mxu1 }
 0x27d   :  { %v2689_v62 = vpop.f32.mrb[3].mxu1 }
 0x28b   :  { %v2971_v63 = vpop.f32.mrb[0].mxu0 }
 0x28c   :  { %v3391_v0 = vadd.f32 %v2971_v63, %v2684_v59  ;;  %v2973_v1 = vpop.f32.mrb[1].mxu0 }
 0x28d   :  { %v3392_v2 = vadd.f32 %v2973_v1, %v2686_v60  ;;  %v2975_v3 = vpop.f32.mrb[2].mxu0 }
 0x28e   :  { %v2978_v4 = vmax.f32 %v3391_v0, 0.0  ;;  %v2976_v5 = vpop.f32.mrb[3].mxu0 }
 0x28f   :  { %v2979_v6 = vmax.f32 %v3392_v2, 0.0 }
 0x290   :  { %2980 = vst [vmem:[#allocation7] sm:$0xff] %v2978_v4 }
 0x291   :  { %2981 = vst [vmem:[#allocation7 + $0x8] sm:$0xff] %v2979_v6 }
 0x292   :  { %4086 = shalt.err (!%p4083_p6)
}
 0x293   :  { %s4087_s10 = scalar_lea.hbm %s4169_s2, 256 }
 0x294   :  { %p4088_p7 = scmp.ne.s32.totalorder %s4169_s2, %s4087_s10  ;;  %p4091_p8 = scmp.lt.u32.totalorder %s4087_s10, %s4169_s2 }
 0x296   :  { %p4093_p9 = pnand %p4091_p8, %p4088_p7 }
 0x298   :  { %4096 = shalt.err (!%p4093_p9)
}
 0x299   :  { %2991 = dma.vmem_to_hbm [thread:$0]  %s2989_s6, 256, %s4169_s2, [#allocation4]  }
 0x29a   :  { %4101 = dma.done.wait [#allocation4], 256  }
 0x29b   :  { %4102 = vsyncadd [#allocation4], 4294967040 }
 0x29c   :  { %2995 = vsyncpa [#allocation3], 1 }
 0x29d   :  { %2996 = vsyncpa [#allocation6], 1 }
 0x29e   :  { %2997 = vsyncpa [#allocation4], 1 }

</bundles_post_ra>
